<compile_context>
chip_gen: v7x
topology: tpu7x:2x2x1
jax: 0.10.0
libtpu: 0.0.40
codegen_flags: <defaults>
</compile_context>

<pallas_src>
import functools
import math

import jax
import jax.numpy as jnp
from jax import lax
from jax.experimental import pallas as pl
from jax.experimental.pallas import tpu as pltpu


def _fused_kernel(nhead, head_dim, L, Lp, Bblk,
                  masks_ref, nodes_in_ref, rowc_ref, seg_ref, segT_ref,
                  w1t_ref, b1_ref, w2t_ref, b2_ref, pg_ref, pb_ref,
                  rqkv_ref, rqkvb_ref, rot_ref, rob_ref, ng_ref, nb_ref,
                  sqkv_ref, sqkvb_ref, sot_ref, sob_ref,
                  buf_ref):
    """One (batch-block, layer) grid step.

    buf_ref is the revisited output block holding [nodes rows 0..L-1 |
    relay at row L | zero padding rows] for Bblk sequences; it carries the
    activations across the layer axis.
    """
    H = buf_ref.shape[-1]
    D = nhead * head_dim
    N = Bblk * Lp
    eps = 1e-5      # PyTorch LayerNorm default
    slope = 0.01    # PyTorch leaky_relu default
    layer = pl.program_id(1)

    # --- hoisted constants (DMA'd once, constant index_map) -----------------
    rowc = rowc_ref[...]                      # (Lp, 4) per-row flags
    prev_ok = rowc[:, 0:1]                    # 1.0 where a left neighbour exists
    next_ok = rowc[:, 1:2]                    # 1.0 where a right neighbour exists
    is_relay = rowc[:, 2:3] > 0.5             # True only at row L
    seg = seg_ref[...]                        # (D, nhead) head lane-sum matrix
    segT = segT_ref[...]                      # (nhead, D) per-head lane broadcast
    masks = masks_ref[...]                    # (Bblk, Lp, 2)
    star_mask = masks[:, :, 0:1]              # 1.0 -> excluded from star attention
    node_keep = masks[:, :, 1:2]              # 1.0 -> keep node row at layer end

    # --- layer 0: initialize the VMEM-resident activation buffer ------------
    @pl.when(layer == 0)
    def _():
        x0 = nodes_in_ref[...]                                   # (Bblk, Lp, H)
        relay0 = jnp.sum(x0, axis=1, keepdims=True) * (1.0 / L)  # mean over L
        buf_ref[...] = jnp.where(is_relay, relay0, x0)

    X = buf_ref[...]                          # (Bblk, Lp, H)
    Xf = X.reshape(N, H)                      # flattened (free: Lp % 8 == 0)

    w1t = w1t_ref[0]; b1 = b1_ref[0]; w2t = w2t_ref[0]; b2 = b2_ref[0]
    pg = pg_ref[0]; pb = pb_ref[0]
    rqkv = rqkv_ref[0]; rqkvb = rqkvb_ref[0]; rot = rot_ref[0]; rob = rob_ref[0]
    ng = ng_ref[0]; nb = nb_ref[0]
    sqkv = sqkv_ref[0]; sqkvb = sqkvb_ref[0]; sot = sot_ref[0]; sob = sob_ref[0]

    def mm(a, w):     # matmul in the weights' dtype (bf16 or f32), f32 accum
        return jnp.dot(a.astype(w.dtype), w, preferred_element_type=jnp.float32)

    def fmm(a, b):    # small f32 matmul (head packing)
        return jnp.dot(a, b, preferred_element_type=jnp.float32)

    def layernorm(y, g, b):   # single-pass mean / E[x^2]
        mu = jnp.mean(y, axis=1, keepdims=True)
        ms = jnp.mean(y * y, axis=1, keepdims=True)
        var = jnp.maximum(ms - mu * mu, 0.0)
        return (y - mu) * lax.rsqrt(var + eps) * g + b

    def leaky(x):
        return jnp.where(x >= 0, x, slope * x)

    # ---------- PositionwiseFeedForward (Conv1d k=1 == linear), flattened ---
    h1 = jnp.maximum(mm(Xf, w1t) + b1, 0.0)
    h2 = mm(h1, w2t) + b2
    pw = layernorm(h2 + Xf, pg, pb)                               # (N, H)

    # ---------- ring attention (_MSA1): window {l-1,l,l+1} + relay ----------
    # relay row must stay raw (not FFN'd) for its K/V projections (ax path).
    xa = jnp.where(is_relay, X, pw.reshape(Bblk, Lp, H)).reshape(N, H)
    qkv = mm(xa, rqkv) + rqkvb                                    # (N, 3D)
    Q = qkv[:, :D]                   # 1/sqrt(head_dim) folded into Q weights
    K = qkv[:, D:2 * D]
    V = qkv[:, 2 * D:]

    # Neighbour shifts via sublane rolls + boundary masks (zero rows at the
    # sequence ends reproduce F.unfold's zero padding; cross-batch / relay
    # leakage of the circular roll is zeroed by the same masks).
    pmask = jnp.broadcast_to(prev_ok, (Bblk, Lp, 1)).reshape(N, 1)
    nmask = jnp.broadcast_to(next_ok, (Bblk, Lp, 1)).reshape(N, 1)
    Kp = pltpu.roll(K, 1, 0) * pmask
    Vp = pltpu.roll(V, 1, 0) * pmask
    Kn = pltpu.roll(K, N - 1, 0) * nmask
    Vn = pltpu.roll(V, N - 1, 0) * nmask

    # relay K/V broadcast over each sequence's rows
    K3 = K.reshape(Bblk, Lp, D)
    V3 = V.reshape(Bblk, Lp, D)
    akb = jnp.broadcast_to(K3[:, L:L + 1, :], (Bblk, Lp, D)).reshape(N, D)
    avb = jnp.broadcast_to(V3[:, L:L + 1, :], (Bblk, Lp, D)).reshape(N, D)

    # Fused 4-branch score matmul: one (4N,D)x(D,nhead) push instead of four.
    P = jnp.concatenate([Q * Kp, Q * K, Q * Kn, Q * akb], axis=0)  # (4N, D)
    s_all = fmm(P, seg)                                            # (4N, nhead)
    s0 = s_all[:N]; s1 = s_all[N:2 * N]
    s2 = s_all[2 * N:3 * N]; s3 = s_all[3 * N:]
    m = jnp.maximum(jnp.maximum(s0, s1), jnp.maximum(s2, s3))
    e0 = jnp.exp(s0 - m); e1 = jnp.exp(s1 - m)
    e2 = jnp.exp(s2 - m); e3 = jnp.exp(s3 - m)
    inv = 1.0 / (e0 + e1 + e2 + e3)                # exact (review correctness)
    A = jnp.concatenate([e0 * inv, e1 * inv, e2 * inv, e3 * inv], axis=0)
    W = fmm(A, segT)                                               # (4N, D)
    att = (W[:N] * Vp + W[N:2 * N] * V +
           W[2 * N:3 * N] * Vn + W[3 * N:] * avb)                  # (N, D)
    ring = mm(att, rot) + rob                                      # (N, H)

    # ---------- LayerNorm over hidden + leaky_relu ---------------------------
    nodes_mid = leaky(layernorm(ring, ng, nb))                     # (N, H)
    nodes3 = nodes_mid.reshape(Bblk, Lp, H)

    # ---------- star attention (_MSA2): relay attends to [relay; nodes] -----
    yseq = jnp.where(is_relay, X, nodes3).reshape(N, H)   # relay row stays raw
    qkv2 = mm(yseq, sqkv) + sqkvb                                  # (N, 3D)
    K2 = qkv2[:, D:2 * D]
    V2 = qkv2[:, 2 * D:].reshape(Bblk, Lp, D)
    Q2 = qkv2[:, :D].reshape(Bblk, Lp, D)
    q2b = jnp.broadcast_to(Q2[:, L:L + 1, :], (Bblk, Lp, D)).reshape(N, D)

    ss = fmm(K2 * q2b, seg).reshape(Bblk, Lp, nhead)
    ss = jnp.where(star_mask > 0, -1e30, ss)          # masked_fill(-inf), f32
    m2 = jnp.max(ss, axis=1, keepdims=True)
    e = jnp.exp(ss - m2)
    a2 = e / jnp.sum(e, axis=1, keepdims=True)                     # (Bblk,Lp,nh)
    aw = fmm(a2.reshape(N, nhead), segT).reshape(Bblk, Lp, D)
    att2 = jnp.sum(aw * V2, axis=1)                                # (Bblk, D)
    rnew = leaky(mm(att2, sot) + sob)                              # (Bblk, H)

    # ---------- masked_fill of padded node positions; update activations ----
    buf_ref[...] = jnp.where(is_relay, rnew[:, None, :], nodes3 * node_keep)


def _prepare_params(params, head_dim, use_bf16):
    """Stack per-layer params on a leading layer axis, fuse Q/K/V weights,
    fold 1/sqrt(head_dim) into the Q weights/biases; matmul weights are cast
    to bf16 only when requested (biases / norm params stay f32)."""
    scale = 1.0 / math.sqrt(head_dim)
    wdt = jnp.bfloat16 if use_bf16 else jnp.float32

    def stack(name):
        return jnp.stack([p[name] for p in params], axis=0)

    w1t = stack("w1t").astype(wdt)
    w2t = stack("w2t").astype(wdt)
    rqkv = jnp.concatenate([stack("rqt") * scale, stack("rkt"), stack("rvt")],
                           axis=2).astype(wdt)
    rqkvb = jnp.concatenate([stack("rqb") * scale, stack("rkb"), stack("rvb")],
                            axis=2)
    rot = stack("rot").astype(wdt)
    sqkv = jnp.concatenate([stack("sqt") * scale, stack("skt"), stack("svt")],
                           axis=2).astype(wdt)
    sqkvb = jnp.concatenate([stack("sqb") * scale, stack("skb"), stack("svb")],
                            axis=2)
    sot = stack("sot").astype(wdt)
    return (w1t, stack("b1"), w2t, stack("b2"), stack("pg"), stack("pb"),
            rqkv, rqkvb, rot, stack("rob"),
            stack("ng"), stack("nb"),
            sqkv, sqkvb, sot, stack("sob"))


def star_plus_transformer(data, mask_valid, params, nhead, head_dim,
                          batch_block=None):
    """data: (B, L, H) float32; mask_valid: (B, L) bool, True == valid token.
    Returns (nodes (B, L, H), relay (B, H))."""
    B, L, H = data.shape
    NL = len(params)
    D = nhead * head_dim
    d_inner = params[0]["w1t"].shape[1]
    Lp = ((L + 1 + 7) // 8) * 8            # relay at row L, padded to 8 rows

    # ------- generation-aware budgets ---------------------------------------
    try:
        phys = int(pltpu.get_tpu_info().vmem_capacity_bytes)
    except Exception:
        phys = 64 << 20                    # be conservative if unknown
    big_vmem = phys > (96 << 20)           # v5e / v6e (128 MiB parts)

    # ------- batch block: divisor of B, >= 2 blocks when possible (v7x), ----
    # ------- fused-matmul rows bounded by a VMEM-friendly row cap -----------
    if batch_block is None:
        max_rows = 2048 if big_vmem else 1024
        Bblk = 1
        for d in range(1, B + 1):
            if B % d:
                continue
            if B >= 2 and (B // d) < 2:
                continue
            if d * Lp > max_rows:
                continue
            Bblk = max(Bblk, d)
    else:
        assert B % batch_block == 0
        Bblk = batch_block
    nb = B // Bblk

    use_bf16 = H >= 128                    # f32 matmuls at small hidden sizes

    # ------- host-side constant / mask preparation --------------------------
    maskp = jnp.logical_not(mask_valid).astype(jnp.float32)        # (B, L)
    nodes0 = jnp.zeros((B, Lp, H), jnp.float32).at[:, :L, :].set(
        data.astype(jnp.float32))

    star_mask = jnp.ones((B, Lp), jnp.float32)        # 1 -> excluded from star
    star_mask = star_mask.at[:, :L].set(maskp).at[:, L].set(0.0)
    node_keep = jnp.zeros((B, Lp), jnp.float32).at[:, :L].set(1.0 - maskp)
    masks = jnp.stack([star_mask, node_keep], axis=-1)             # (B, Lp, 2)

    rows = jnp.arange(Lp)
    rowc = jnp.stack([
        ((rows >= 1) & (rows <= L - 1)).astype(jnp.float32),       # prev_ok
        (rows <= L - 2).astype(jnp.float32),                       # next_ok
        (rows == L).astype(jnp.float32),                           # is_relay
        jnp.zeros((Lp,), jnp.float32),
    ], axis=-1)                                                    # (Lp, 4)

    seg = (jnp.arange(D)[:, None] // head_dim ==
           jnp.arange(nhead)[None, :]).astype(jnp.float32)         # (D, nhead)
    segT = (jnp.arange(nhead)[:, None] ==
            jnp.arange(D)[None, :] // head_dim).astype(jnp.float32)  # (nhead, D)

    weights = _prepare_params(params, head_dim, use_bf16)

    # ------- BlockSpecs ------------------------------------------------------
    def bspec(shape):      # blocked over batch, whole array otherwise
        nd = len(shape)
        return pl.BlockSpec((Bblk,) + tuple(shape[1:]),
                            lambda b, l: (b,) + (0,) * (nd - 1))

    def cspec(shape):      # hoisted constant: full array, constant index
        nd = len(shape)
        return pl.BlockSpec(tuple(shape), lambda b, l: (0,) * nd)

    nbuf = 3 if (big_vmem and NL >= 3) else 2   # deeper weight streaming on
                                                # 128 MiB parts (v5e/v6e)

    def wspec(shape):      # per-layer weight slab, streamed over layer axis
        nd = len(shape)
        blk = (1,) + tuple(shape[1:])
        idx = lambda b, l: (l,) + (0,) * (nd - 1)
        if nbuf > 2:
            try:
                return pl.BlockSpec(blk, idx, pipeline_mode=pl.Buffered(nbuf))
            except TypeError:
                return pl.BlockSpec(blk, idx)
        return pl.BlockSpec(blk, idx)

    inputs = (masks, nodes0, rowc, seg, segT) + weights
    in_specs = [bspec(masks.shape), bspec(nodes0.shape),
                cspec(rowc.shape), cspec(seg.shape), cspec(segT.shape)]
    in_specs += [wspec(w.shape) for w in weights]

    out_shape = jax.ShapeDtypeStruct((B, Lp, H), jnp.float32)
    out_spec = pl.BlockSpec((Bblk, Lp, H), lambda b, l: (b, 0, 0))

    # ------- VMEM limit: include weight slabs, blocks and intermediates -----
    f32b = 4
    wb = 2 if use_bf16 else 4
    N = Bblk * Lp
    slab = (wb * (2 * H * d_inner + 2 * H * 3 * D + 2 * D * H)
            + f32b * (d_inner + 7 * H + 6 * D))              # biases / norms
    act_blocks = f32b * Bblk * Lp * (2 * H + 2)              # in + out + masks
    inter = f32b * N * (d_inner + 17 * D + 6 * H + 12 * max(nhead, 8))
    need = nbuf * slab + 2 * act_blocks + inter + (4 << 20)
    cap = (36 << 20) if phys <= (72 << 20) else (96 << 20)   # v7x vs v5e/v6e
    vmem_limit = int(min(max(need, 16 << 20), cap))

    kernel = functools.partial(_fused_kernel, nhead, head_dim, L, Lp, Bblk)
    buf = pl.pallas_call(
        kernel,
        grid=(nb, NL),
        in_specs=in_specs,
        out_specs=out_spec,
        out_shape=out_shape,
        compiler_params=pltpu.CompilerParams(
            dimension_semantics=("parallel", "arbitrary"),
            vmem_limit_bytes=vmem_limit),
    )(*inputs)

    return buf[:, :L, :], buf[:, L, :]        # (B, L, H), (B, H)


def init_params(key, num_layers, H, nhead, head_dim, d_inner):
    D = nhead * head_dim
    params = []

    def rn(k, shape, scale):
        return (scale * jax.random.normal(k, shape)).astype(jnp.float32)

    for _ in range(num_layers):
        key, *ks = jax.random.split(key, 17)
        p = {
            # PositionwiseFeedForward (weights stored pre-transposed: (in, out))
            "w1t": rn(ks[0], (H, d_inner), 0.1), "b1": rn(ks[1], (1, d_inner), 0.01),
            "w2t": rn(ks[2], (d_inner, H), 0.1), "b2": rn(ks[3], (1, H), 0.01),
            "pg": jnp.ones((1, H), jnp.float32), "pb": jnp.zeros((1, H), jnp.float32),
            # ring attention (_MSA1) 1x1 convs
            "rqt": rn(ks[4], (H, D), 0.1), "rqb": rn(ks[5], (1, D), 0.01),
            "rkt": rn(ks[6], (H, D), 0.1), "rkb": rn(ks[7], (1, D), 0.01),
            "rvt": rn(ks[8], (H, D), 0.1), "rvb": rn(ks[9], (1, D), 0.01),
            "rot": rn(ks[10], (D, H), 0.1), "rob": rn(ks[11], (1, H), 0.01),
            # per-layer LayerNorm
            "ng": jnp.ones((1, H), jnp.float32), "nb": jnp.zeros((1, H), jnp.float32),
            # star attention (_MSA2) 1x1 convs
            "sqt": rn(ks[12], (H, D), 0.1), "sqb": jnp.zeros((1, D), jnp.float32),
            "skt": rn(ks[13], (H, D), 0.1), "skb": jnp.zeros((1, D), jnp.float32),
            "svt": rn(ks[14], (H, D), 0.1), "svb": jnp.zeros((1, D), jnp.float32),
            "sot": rn(ks[15], (D, H), 0.1), "sob": jnp.zeros((1, H), jnp.float32),
        }
        params.append(p)
    return params


if __name__ == "__main__":
    B, L, H = 2, 8, 32
    num_layers, nhead, head_dim, d_inner = 2, 4, 8, 64

    key = jax.random.PRNGKey(0)
    kd, kp = jax.random.split(key)
    data = jax.random.normal(kd, (B, L, H), jnp.float32)
    # mask: True == valid token; batch 1 has two padded positions at the end
    mask_valid = (jnp.ones((B, L), dtype=bool)
                  .at[1, L - 1].set(False).at[1, L - 2].set(False))

    params = init_params(kp, num_layers, H, nhead, head_dim, d_inner)

    nodes, relay = star_plus_transformer(data, mask_valid, params, nhead, head_dim)
    nodes = jax.block_until_ready(nodes)
    relay = jax.block_until_ready(relay)

    assert nodes.shape == (B, L, H) and relay.shape == (B, H)
    assert bool(jnp.all(jnp.isfinite(nodes))) and bool(jnp.all(jnp.isfinite(relay)))
    # padded node positions must be exactly zero (masked_fill semantics)
    assert bool(jnp.all(nodes[1, L - 2:, :] == 0.0))
    print("KERNEL_OK")
</pallas_src>

<mosaic_0001>
module attributes {stable_mosaic.version = 11 : i64} {
  func.func @_fused_kernel(%arg0: i32, %arg1: i32, %arg2: memref<1x16x2xf32, #tpu.memory_space<vmem>>, %arg3: memref<1x16x32xf32, #tpu.memory_space<vmem>>, %arg4: memref<16x4xf32, #tpu.memory_space<vmem>>, %arg5: memref<32x4xf32, #tpu.memory_space<vmem>>, %arg6: memref<4x32xf32, #tpu.memory_space<vmem>>, %arg7: memref<1x32x64xf32, #tpu.memory_space<vmem>>, %arg8: memref<1x1x64xf32, #tpu.memory_space<vmem>>, %arg9: memref<1x64x32xf32, #tpu.memory_space<vmem>>, %arg10: memref<1x1x32xf32, #tpu.memory_space<vmem>>, %arg11: memref<1x1x32xf32, #tpu.memory_space<vmem>>, %arg12: memref<1x1x32xf32, #tpu.memory_space<vmem>>, %arg13: memref<1x32x96xf32, #tpu.memory_space<vmem>>, %arg14: memref<1x1x96xf32, #tpu.memory_space<vmem>>, %arg15: memref<1x32x32xf32, #tpu.memory_space<vmem>>, %arg16: memref<1x1x32xf32, #tpu.memory_space<vmem>>, %arg17: memref<1x1x32xf32, #tpu.memory_space<vmem>>, %arg18: memref<1x1x32xf32, #tpu.memory_space<vmem>>, %arg19: memref<1x32x96xf32, #tpu.memory_space<vmem>>, %arg20: memref<1x1x96xf32, #tpu.memory_space<vmem>>, %arg21: memref<1x32x32xf32, #tpu.memory_space<vmem>>, %arg22: memref<1x1x32xf32, #tpu.memory_space<vmem>>, %arg23: memref<1x16x32xf32, #tpu.memory_space<vmem>>) attributes {dimension_semantics = [#tpu.dimension_semantics<parallel>, #tpu.dimension_semantics<arbitrary>], iteration_bounds = array<i64: 2, 2>, scalar_prefetch = 0 : i64, scratch_operands = 0 : i64, tpu.core_type = #tpu.core_type<tc>, window_params = [{transform_indices = @transform_0, window_bounds = array<i64: 1, 16, 2>}, {transform_indices = @transform_1, window_bounds = array<i64: 1, 16, 32>}, {pipeline_mode = #tpu.pipeline_mode<synchronous>, transform_indices = @transform_2, window_bounds = array<i64: 16, 4>}, {pipeline_mode = #tpu.pipeline_mode<synchronous>, transform_indices = @transform_3, window_bounds = array<i64: 32, 4>}, {pipeline_mode = #tpu.pipeline_mode<synchronous>, transform_indices = @transform_4, window_bounds = array<i64: 4, 32>}, {transform_indices = @transform_5, window_bounds = array<i64: 1, 32, 64>}, {transform_indices = @transform_6, window_bounds = array<i64: 1, 1, 64>}, {transform_indices = @transform_7, window_bounds = array<i64: 1, 64, 32>}, {transform_indices = @transform_8, window_bounds = array<i64: 1, 1, 32>}, {transform_indices = @transform_9, window_bounds = array<i64: 1, 1, 32>}, {transform_indices = @transform_10, window_bounds = array<i64: 1, 1, 32>}, {transform_indices = @transform_11, window_bounds = array<i64: 1, 32, 96>}, {transform_indices = @transform_12, window_bounds = array<i64: 1, 1, 96>}, {transform_indices = @transform_13, window_bounds = array<i64: 1, 32, 32>}, {transform_indices = @transform_14, window_bounds = array<i64: 1, 1, 32>}, {transform_indices = @transform_15, window_bounds = array<i64: 1, 1, 32>}, {transform_indices = @transform_16, window_bounds = array<i64: 1, 1, 32>}, {transform_indices = @transform_17, window_bounds = array<i64: 1, 32, 96>}, {transform_indices = @transform_18, window_bounds = array<i64: 1, 1, 96>}, {transform_indices = @transform_19, window_bounds = array<i64: 1, 32, 32>}, {transform_indices = @transform_20, window_bounds = array<i64: 1, 1, 32>}, {transform_indices = @transform_21, window_bounds = array<i64: 1, 16, 32>}]} {
    %c0 = arith.constant 0 : index
    %c0_0 = arith.constant 0 : index
    %0 = vector.load %arg4[%c0, %c0_0] : memref<16x4xf32, #tpu.memory_space<vmem>>, vector<16x4xf32>
    %1 = vector.extract_strided_slice %0 {offsets = [0, 0], sizes = [16, 1], strides = [1, 1]} : vector<16x4xf32> to vector<16x1xf32>
    %2 = vector.extract_strided_slice %0 {offsets = [0, 1], sizes = [16, 1], strides = [1, 1]} : vector<16x4xf32> to vector<16x1xf32>
    %3 = vector.extract_strided_slice %0 {offsets = [0, 2], sizes = [16, 1], strides = [1, 1]} : vector<16x4xf32> to vector<16x1xf32>
    %cst = arith.constant 5.000000e-01 : f32
    %4 = vector.broadcast %cst : f32 to vector<16x1xf32>
    %5 = arith.cmpf ogt, %3, %4 : vector<16x1xf32>
    %c0_1 = arith.constant 0 : index
    %c0_2 = arith.constant 0 : index
    %6 = vector.load %arg5[%c0_1, %c0_2] : memref<32x4xf32, #tpu.memory_space<vmem>>, vector<32x4xf32>
    %c0_3 = arith.constant 0 : index
    %c0_4 = arith.constant 0 : index
    %7 = vector.load %arg6[%c0_3, %c0_4] : memref<4x32xf32, #tpu.memory_space<vmem>>, vector<4x32xf32>
    %c0_5 = arith.constant 0 : index
    %c0_6 = arith.constant 0 : index
    %c0_7 = arith.constant 0 : index
    %8 = vector.load %arg2[%c0_5, %c0_6, %c0_7] : memref<1x16x2xf32, #tpu.memory_space<vmem>>, vector<1x16x2xf32>
    %9 = vector.extract_strided_slice %8 {offsets = [0, 0, 0], sizes = [1, 16, 1], strides = [1, 1, 1]} : vector<1x16x2xf32> to vector<1x16x1xf32>
    %10 = vector.extract_strided_slice %8 {offsets = [0, 0, 1], sizes = [1, 16, 1], strides = [1, 1, 1]} : vector<1x16x2xf32> to vector<1x16x1xf32>
    %c0_i32 = arith.constant 0 : i32
    %11 = arith.cmpi eq, %arg1, %c0_i32 : i32
    %12 = arith.extui %11 : i1 to i32
    %c0_i32_8 = arith.constant 0 : i32
    %13 = arith.cmpi ne, %12, %c0_i32_8 : i32
    scf.if %13 {
      %c0_98 = arith.constant 0 : index
      %c0_99 = arith.constant 0 : index
      %c0_100 = arith.constant 0 : index
      %249 = vector.load %arg3[%c0_98, %c0_99, %c0_100] : memref<1x16x32xf32, #tpu.memory_space<vmem>>, vector<1x16x32xf32>
      %cst_101 = arith.constant dense<0.000000e+00> : vector<1x32xf32>
      %250 = vector.multi_reduction <add>, %249, %cst_101 [1] : vector<1x16x32xf32> to vector<1x32xf32>
      %251 = vector.shape_cast %250 : vector<1x32xf32> to vector<1x1x32xf32>
      %cst_102 = arith.constant 1.250000e-01 : f32
      %252 = vector.broadcast %cst_102 : f32 to vector<1x1x32xf32>
      %253 = arith.mulf %251, %252 : vector<1x1x32xf32>
      %254 = vector.shape_cast %5 : vector<16x1xi1> to vector<1x16x1xi1>
      %255 = vector.broadcast %254 : vector<1x16x1xi1> to vector<1x16x32xi1>
      %256 = vector.shape_cast %253 : vector<1x1x32xf32> to vector<1x1x32xf32>
      %257 = vector.broadcast %256 : vector<1x1x32xf32> to vector<1x16x32xf32>
      %258 = arith.select %255, %257, %249 : vector<1x16x32xi1>, vector<1x16x32xf32>
      %c0_103 = arith.constant 0 : index
      %c0_104 = arith.constant 0 : index
      %c0_105 = arith.constant 0 : index
      %259 = vector.load %arg23[%c0_103, %c0_104, %c0_105] : memref<1x16x32xf32, #tpu.memory_space<vmem>>, vector<1x16x32xf32>
      tpu.vector_store %arg23[%c0_103, %c0_104, %c0_105], %258 {strides = array<i32>} : memref<1x16x32xf32, #tpu.memory_space<vmem>>, vector<1x16x32xf32>,
    } else {
    }
    %c0_9 = arith.constant 0 : index
    %c0_10 = arith.constant 0 : index
    %c0_11 = arith.constant 0 : index
    %14 = vector.load %arg23[%c0_9, %c0_10, %c0_11] : memref<1x16x32xf32, #tpu.memory_space<vmem>>, vector<1x16x32xf32>
    %15 = vector.shape_cast %14 : vector<1x16x32xf32> to vector<16x32xf32>
    %c0_12 = arith.constant 0 : index
    %c0_13 = arith.constant 0 : index
    %c0_14 = arith.constant 0 : index
    %16 = vector.load %arg7[%c0_12, %c0_13, %c0_14] : memref<1x32x64xf32, #tpu.memory_space<vmem>>, vector<1x32x64xf32>
    %17 = vector.shape_cast %16 : vector<1x32x64xf32> to vector<32x64xf32>
    %c0_15 = arith.constant 0 : index
    %c0_16 = arith.constant 0 : index
    %c0_17 = arith.constant 0 : index
    %18 = vector.load %arg8[%c0_15, %c0_16, %c0_17] : memref<1x1x64xf32, #tpu.memory_space<vmem>>, vector<1x1x64xf32>
    %19 = vector.shape_cast %18 : vector<1x1x64xf32> to vector<1x64xf32>
    %c0_18 = arith.constant 0 : index
    %c0_19 = arith.constant 0 : index
    %c0_20 = arith.constant 0 : index
    %20 = vector.load %arg9[%c0_18, %c0_19, %c0_20] : memref<1x64x32xf32, #tpu.memory_space<vmem>>, vector<1x64x32xf32>
    %21 = vector.shape_cast %20 : vector<1x64x32xf32> to vector<64x32xf32>
    %c0_21 = arith.constant 0 : index
    %c0_22 = arith.constant 0 : index
    %c0_23 = arith.constant 0 : index
    %22 = vector.load %arg10[%c0_21, %c0_22, %c0_23] : memref<1x1x32xf32, #tpu.memory_space<vmem>>, vector<1x1x32xf32>
    %23 = vector.shape_cast %22 : vector<1x1x32xf32> to vector<1x32xf32>
    %c0_24 = arith.constant 0 : index
    %c0_25 = arith.constant 0 : index
    %c0_26 = arith.constant 0 : index
    %24 = vector.load %arg11[%c0_24, %c0_25, %c0_26] : memref<1x1x32xf32, #tpu.memory_space<vmem>>, vector<1x1x32xf32>
    %25 = vector.shape_cast %24 : vector<1x1x32xf32> to vector<1x32xf32>
    %c0_27 = arith.constant 0 : index
    %c0_28 = arith.constant 0 : index
    %c0_29 = arith.constant 0 : index
    %26 = vector.load %arg12[%c0_27, %c0_28, %c0_29] : memref<1x1x32xf32, #tpu.memory_space<vmem>>, vector<1x1x32xf32>
    %27 = vector.shape_cast %26 : vector<1x1x32xf32> to vector<1x32xf32>
    %c0_30 = arith.constant 0 : index
    %c0_31 = arith.constant 0 : index
    %c0_32 = arith.constant 0 : index
    %28 = vector.load %arg13[%c0_30, %c0_31, %c0_32] : memref<1x32x96xf32, #tpu.memory_space<vmem>>, vector<1x32x96xf32>
    %29 = vector.shape_cast %28 : vector<1x32x96xf32> to vector<32x96xf32>
    %c0_33 = arith.constant 0 : index
    %c0_34 = arith.constant 0 : index
    %c0_35 = arith.constant 0 : index
    %30 = vector.load %arg14[%c0_33, %c0_34, %c0_35] : memref<1x1x96xf32, #tpu.memory_space<vmem>>, vector<1x1x96xf32>
    %31 = vector.shape_cast %30 : vector<1x1x96xf32> to vector<1x96xf32>
    %c0_36 = arith.constant 0 : index
    %c0_37 = arith.constant 0 : index
    %c0_38 = arith.constant 0 : index
    %32 = vector.load %arg15[%c0_36, %c0_37, %c0_38] : memref<1x32x32xf32, #tpu.memory_space<vmem>>, vector<1x32x32xf32>
    %33 = vector.shape_cast %32 : vector<1x32x32xf32> to vector<32x32xf32>
    %c0_39 = arith.constant 0 : index
    %c0_40 = arith.constant 0 : index
    %c0_41 = arith.constant 0 : index
    %34 = vector.load %arg16[%c0_39, %c0_40, %c0_41] : memref<1x1x32xf32, #tpu.memory_space<vmem>>, vector<1x1x32xf32>
    %35 = vector.shape_cast %34 : vector<1x1x32xf32> to vector<1x32xf32>
    %c0_42 = arith.constant 0 : index
    %c0_43 = arith.constant 0 : index
    %c0_44 = arith.constant 0 : index
    %36 = vector.load %arg17[%c0_42, %c0_43, %c0_44] : memref<1x1x32xf32, #tpu.memory_space<vmem>>, vector<1x1x32xf32>
    %37 = vector.shape_cast %36 : vector<1x1x32xf32> to vector<1x32xf32>
    %c0_45 = arith.constant 0 : index
    %c0_46 = arith.constant 0 : index
    %c0_47 = arith.constant 0 : index
    %38 = vector.load %arg18[%c0_45, %c0_46, %c0_47] : memref<1x1x32xf32, #tpu.memory_space<vmem>>, vector<1x1x32xf32>
    %39 = vector.shape_cast %38 : vector<1x1x32xf32> to vector<1x32xf32>
    %c0_48 = arith.constant 0 : index
    %c0_49 = arith.constant 0 : index
    %c0_50 = arith.constant 0 : index
    %40 = vector.load %arg19[%c0_48, %c0_49, %c0_50] : memref<1x32x96xf32, #tpu.memory_space<vmem>>, vector<1x32x96xf32>
    %41 = vector.shape_cast %40 : vector<1x32x96xf32> to vector<32x96xf32>
    %c0_51 = arith.constant 0 : index
    %c0_52 = arith.constant 0 : index
    %c0_53 = arith.constant 0 : index
    %42 = vector.load %arg20[%c0_51, %c0_52, %c0_53] : memref<1x1x96xf32, #tpu.memory_space<vmem>>, vector<1x1x96xf32>
    %43 = vector.shape_cast %42 : vector<1x1x96xf32> to vector<1x96xf32>
    %c0_54 = arith.constant 0 : index
    %c0_55 = arith.constant 0 : index
    %c0_56 = arith.constant 0 : index
    %44 = vector.load %arg21[%c0_54, %c0_55, %c0_56] : memref<1x32x32xf32, #tpu.memory_space<vmem>>, vector<1x32x32xf32>
    %45 = vector.shape_cast %44 : vector<1x32x32xf32> to vector<32x32xf32>
    %c0_57 = arith.constant 0 : index
    %c0_58 = arith.constant 0 : index
    %c0_59 = arith.constant 0 : index
    %46 = vector.load %arg22[%c0_57, %c0_58, %c0_59] : memref<1x1x32xf32, #tpu.memory_space<vmem>>, vector<1x1x32xf32>
    %47 = vector.shape_cast %46 : vector<1x1x32xf32> to vector<1x32xf32>
    %cst_60 = arith.constant dense<0.000000e+00> : vector<16x64xf32>
    %48 = tpu.matmul %15, %17, %cst_60 {dimension_numbers = #tpu.dot_dimension_numbers<[1], [0], [0], [1], [0, 0, 1, 1], [], []>} : vector<16x32xf32>, vector<32x64xf32>, vector<16x64xf32> -> vector<16x64xf32>
    %49 = vector.broadcast %19 : vector<1x64xf32> to vector<16x64xf32>
    %50 = arith.addf %48, %49 : vector<16x64xf32>
    %cst_61 = arith.constant 0.000000e+00 : f32
    %51 = vector.broadcast %cst_61 : f32 to vector<16x64xf32>
    %52 = arith.maximumf %50, %51 : vector<16x64xf32>
    %cst_62 = arith.constant dense<0.000000e+00> : vector<16x32xf32>
    %53 = tpu.matmul %52, %21, %cst_62 {dimension_numbers = #tpu.dot_dimension_numbers<[1], [0], [0], [1], [0, 0, 1, 1], [], []>} : vector<16x64xf32>, vector<64x32xf32>, vector<16x32xf32> -> vector<16x32xf32>
    %54 = vector.broadcast %23 : vector<1x32xf32> to vector<16x32xf32>
    %55 = arith.addf %53, %54 : vector<16x32xf32>
    %56 = arith.addf %55, %15 : vector<16x32xf32>
    %cst_63 = arith.constant dense<0.000000e+00> : vector<16xf32>
    %57 = vector.multi_reduction <add>, %56, %cst_63 [1] : vector<16x32xf32> to vector<16xf32>
    %58 = vector.shape_cast %57 : vector<16xf32> to vector<16x1xf32>
    %cst_64 = arith.constant 3.200000e+01 : f32
    %59 = vector.broadcast %cst_64 : f32 to vector<16x1xf32>
    %60 = arith.divf %58, %59 : vector<16x1xf32>
    %61 = arith.mulf %56, %56 : vector<16x32xf32>
    %cst_65 = arith.constant dense<0.000000e+00> : vector<16xf32>
    %62 = vector.multi_reduction <add>, %61, %cst_65 [1] : vector<16x32xf32> to vector<16xf32>
    %63 = vector.shape_cast %62 : vector<16xf32> to vector<16x1xf32>
    %cst_66 = arith.constant 3.200000e+01 : f32
    %64 = vector.broadcast %cst_66 : f32 to vector<16x1xf32>
    %65 = arith.divf %63, %64 : vector<16x1xf32>
    %66 = arith.mulf %60, %60 : vector<16x1xf32>
    %67 = arith.subf %65, %66 : vector<16x1xf32>
    %cst_67 = arith.constant 0.000000e+00 : f32
    %68 = vector.broadcast %cst_67 : f32 to vector<16x1xf32>
    %69 = arith.maximumf %67, %68 : vector<16x1xf32>
    %70 = vector.broadcast %60 : vector<16x1xf32> to vector<16x32xf32>
    %71 = arith.subf %56, %70 : vector<16x32xf32>
    %cst_68 = arith.constant 9.99999974E-6 : f32
    %72 = vector.broadcast %cst_68 : f32 to vector<16x1xf32>
    %73 = arith.addf %69, %72 : vector<16x1xf32>
    %74 = math.rsqrt %73 : vector<16x1xf32>
    %75 = vector.broadcast %74 : vector<16x1xf32> to vector<16x32xf32>
    %76 = arith.mulf %71, %75 : vector<16x32xf32>
    %77 = vector.broadcast %25 : vector<1x32xf32> to vector<16x32xf32>
    %78 = arith.mulf %76, %77 : vector<16x32xf32>
    %79 = vector.broadcast %27 : vector<1x32xf32> to vector<16x32xf32>
    %80 = arith.addf %78, %79 : vector<16x32xf32>
    %81 = vector.shape_cast %80 : vector<16x32xf32> to vector<1x16x32xf32>
    %82 = vector.shape_cast %5 : vector<16x1xi1> to vector<1x16x1xi1>
    %83 = vector.broadcast %82 : vector<1x16x1xi1> to vector<1x16x32xi1>
    %84 = arith.select %83, %14, %81 : vector<1x16x32xi1>, vector<1x16x32xf32>
    %85 = vector.shape_cast %84 : vector<1x16x32xf32> to vector<16x32xf32>
    %cst_69 = arith.constant dense<0.000000e+00> : vector<16x96xf32>
    %86 = tpu.matmul %85, %29, %cst_69 {dimension_numbers = #tpu.dot_dimension_numbers<[1], [0], [0], [1], [0, 0, 1, 1], [], []>} : vector<16x32xf32>, vector<32x96xf32>, vector<16x96xf32> -> vector<16x96xf32>
    %87 = vector.broadcast %31 : vector<1x96xf32> to vector<16x96xf32>
    %88 = arith.addf %86, %87 : vector<16x96xf32>
    %89 = vector.extract_strided_slice %88 {offsets = [0, 0], sizes = [16, 32], strides = [1, 1]} : vector<16x96xf32> to vector<16x32xf32>
    %90 = vector.extract_strided_slice %88 {offsets = [0, 32], sizes = [16, 32], strides = [1, 1]} : vector<16x96xf32> to vector<16x32xf32>
    %91 = vector.extract_strided_slice %88 {offsets = [0, 64], sizes = [16, 32], strides = [1, 1]} : vector<16x96xf32> to vector<16x32xf32>
    %92 = vector.shape_cast %1 : vector<16x1xf32> to vector<1x16x1xf32>
    %93 = vector.shape_cast %92 : vector<1x16x1xf32> to vector<16x1xf32>
    %94 = vector.shape_cast %2 : vector<16x1xf32> to vector<1x16x1xf32>
    %95 = vector.shape_cast %94 : vector<1x16x1xf32> to vector<16x1xf32>
    %c1_i32 = arith.constant 1 : i32
    %96 = tpu.dynamic_rotate %90 by %c1_i32 dim 0 : vector<16x32xf32>, i32 -> vector<16x32xf32>
    %97 = vector.broadcast %93 : vector<16x1xf32> to vector<16x32xf32>
    %98 = arith.mulf %96, %97 : vector<16x32xf32>
    %c1_i32_70 = arith.constant 1 : i32
    %99 = tpu.dynamic_rotate %91 by %c1_i32_70 dim 0 : vector<16x32xf32>, i32 -> vector<16x32xf32>
    %100 = vector.broadcast %93 : vector<16x1xf32> to vector<16x32xf32>
    %101 = arith.mulf %99, %100 : vector<16x32xf32>
    %c15_i32 = arith.constant 15 : i32
    %102 = tpu.dynamic_rotate %90 by %c15_i32 dim 0 : vector<16x32xf32>, i32 -> vector<16x32xf32>
    %103 = vector.broadcast %95 : vector<16x1xf32> to vector<16x32xf32>
    %104 = arith.mulf %102, %103 : vector<16x32xf32>
    %c15_i32_71 = arith.constant 15 : i32
    %105 = tpu.dynamic_rotate %91 by %c15_i32_71 dim 0 : vector<16x32xf32>, i32 -> vector<16x32xf32>
    %106 = vector.broadcast %95 : vector<16x1xf32> to vector<16x32xf32>
    %107 = arith.mulf %105, %106 : vector<16x32xf32>
    %108 = vector.shape_cast %90 : vector<16x32xf32> to vector<1x16x32xf32>
    %109 = vector.shape_cast %91 : vector<16x32xf32> to vector<1x16x32xf32>
    %110 = vector.extract_strided_slice %108 {offsets = [0, 8, 0], sizes = [1, 1, 32], strides = [1, 1, 1]} : vector<1x16x32xf32> to vector<1x1x32xf32>
    %111 = vector.shape_cast %110 : vector<1x1x32xf32> to vector<1x1x32xf32>
    %112 = vector.broadcast %111 : vector<1x1x32xf32> to vector<1x16x32xf32>
    %113 = vector.shape_cast %112 : vector<1x16x32xf32> to vector<16x32xf32>
    %114 = vector.extract_strided_slice %109 {offsets = [0, 8, 0], sizes = [1, 1, 32], strides = [1, 1, 1]} : vector<1x16x32xf32> to vector<1x1x32xf32>
    %115 = vector.shape_cast %114 : vector<1x1x32xf32> to vector<1x1x32xf32>
    %116 = vector.broadcast %115 : vector<1x1x32xf32> to vector<1x16x32xf32>
    %117 = vector.shape_cast %116 : vector<1x16x32xf32> to vector<16x32xf32>
    %118 = arith.mulf %89, %98 : vector<16x32xf32>
    %119 = arith.mulf %89, %90 : vector<16x32xf32>
    %120 = arith.mulf %89, %104 : vector<16x32xf32>
    %121 = arith.mulf %89, %113 : vector<16x32xf32>
    %122 = tpu.concatenate %118, %119, %120, %121 in 0 : vector<16x32xf32>, vector<16x32xf32>, vector<16x32xf32>, vector<16x32xf32> -> vector<64x32xf32>
    %cst_72 = arith.constant dense<0.000000e+00> : vector<64x4xf32>
    %123 = tpu.matmul %122, %6, %cst_72 {dimension_numbers = #tpu.dot_dimension_numbers<[1], [0], [0], [1], [0, 0, 1, 1], [], []>} : vector<64x32xf32>, vector<32x4xf32>, vector<64x4xf32> -> vector<64x4xf32>
    %124 = vector.extract_strided_slice %123 {offsets = [0, 0], sizes = [16, 4], strides = [1, 1]} : vector<64x4xf32> to vector<16x4xf32>
    %125 = vector.extract_strided_slice %123 {offsets = [16, 0], sizes = [16, 4], strides = [1, 1]} : vector<64x4xf32> to vector<16x4xf32>
    %126 = vector.extract_strided_slice %123 {offsets = [32, 0], sizes = [16, 4], strides = [1, 1]} : vector<64x4xf32> to vector<16x4xf32>
    %127 = vector.extract_strided_slice %123 {offsets = [48, 0], sizes = [16, 4], strides = [1, 1]} : vector<64x4xf32> to vector<16x4xf32>
    %128 = arith.maximumf %124, %125 : vector<16x4xf32>
    %129 = arith.maximumf %126, %127 : vector<16x4xf32>
    %130 = arith.maximumf %128, %129 : vector<16x4xf32>
    %131 = arith.subf %124, %130 : vector<16x4xf32>
    %132 = math.exp %131 : vector<16x4xf32>
    %133 = arith.subf %125, %130 : vector<16x4xf32>
    %134 = math.exp %133 : vector<16x4xf32>
    %135 = arith.subf %126, %130 : vector<16x4xf32>
    %136 = math.exp %135 : vector<16x4xf32>
    %137 = arith.subf %127, %130 : vector<16x4xf32>
    %138 = math.exp %137 : vector<16x4xf32>
    %139 = arith.addf %132, %134 : vector<16x4xf32>
    %140 = arith.addf %139, %136 : vector<16x4xf32>
    %141 = arith.addf %140, %138 : vector<16x4xf32>
    %cst_73 = arith.constant 1.000000e+00 : f32
    %142 = vector.broadcast %cst_73 : f32 to vector<16x4xf32>
    %143 = arith.divf %142, %141 : vector<16x4xf32>
    %144 = arith.mulf %132, %143 : vector<16x4xf32>
    %145 = arith.mulf %134, %143 : vector<16x4xf32>
    %146 = arith.mulf %136, %143 : vector<16x4xf32>
    %147 = arith.mulf %138, %143 : vector<16x4xf32>
    %148 = tpu.concatenate %144, %145, %146, %147 in 0 : vector<16x4xf32>, vector<16x4xf32>, vector<16x4xf32>, vector<16x4xf32> -> vector<64x4xf32>
    %cst_74 = arith.constant dense<0.000000e+00> : vector<64x32xf32>
    %149 = tpu.matmul %148, %7, %cst_74 {dimension_numbers = #tpu.dot_dimension_numbers<[1], [0], [0], [1], [0, 0, 1, 1], [], []>} : vector<64x4xf32>, vector<4x32xf32>, vector<64x32xf32> -> vector<64x32xf32>
    %150 = vector.extract_strided_slice %149 {offsets = [0, 0], sizes = [16, 32], strides = [1, 1]} : vector<64x32xf32> to vector<16x32xf32>
    %151 = arith.mulf %150, %101 : vector<16x32xf32>
    %152 = vector.extract_strided_slice %149 {offsets = [16, 0], sizes = [16, 32], strides = [1, 1]} : vector<64x32xf32> to vector<16x32xf32>
    %153 = arith.mulf %152, %91 : vector<16x32xf32>
    %154 = arith.addf %151, %153 : vector<16x32xf32>
    %155 = vector.extract_strided_slice %149 {offsets = [32, 0], sizes = [16, 32], strides = [1, 1]} : vector<64x32xf32> to vector<16x32xf32>
    %156 = arith.mulf %155, %107 : vector<16x32xf32>
    %157 = arith.addf %154, %156 : vector<16x32xf32>
    %158 = vector.extract_strided_slice %149 {offsets = [48, 0], sizes = [16, 32], strides = [1, 1]} : vector<64x32xf32> to vector<16x32xf32>
    %159 = arith.mulf %158, %117 : vector<16x32xf32>
    %160 = arith.addf %157, %159 : vector<16x32xf32>
    %cst_75 = arith.constant dense<0.000000e+00> : vector<16x32xf32>
    %161 = tpu.matmul %160, %33, %cst_75 {dimension_numbers = #tpu.dot_dimension_numbers<[1], [0], [0], [1], [0, 0, 1, 1], [], []>} : vector<16x32xf32>, vector<32x32xf32>, vector<16x32xf32> -> vector<16x32xf32>
    %162 = vector.broadcast %35 : vector<1x32xf32> to vector<16x32xf32>
    %163 = arith.addf %161, %162 : vector<16x32xf32>
    %cst_76 = arith.constant dense<0.000000e+00> : vector<16xf32>
    %164 = vector.multi_reduction <add>, %163, %cst_76 [1] : vector<16x32xf32> to vector<16xf32>
    %165 = vector.shape_cast %164 : vector<16xf32> to vector<16x1xf32>
    %cst_77 = arith.constant 3.200000e+01 : f32
    %166 = vector.broadcast %cst_77 : f32 to vector<16x1xf32>
    %167 = arith.divf %165, %166 : vector<16x1xf32>
    %168 = arith.mulf %163, %163 : vector<16x32xf32>
    %cst_78 = arith.constant dense<0.000000e+00> : vector<16xf32>
    %169 = vector.multi_reduction <add>, %168, %cst_78 [1] : vector<16x32xf32> to vector<16xf32>
    %170 = vector.shape_cast %169 : vector<16xf32> to vector<16x1xf32>
    %cst_79 = arith.constant 3.200000e+01 : f32
    %171 = vector.broadcast %cst_79 : f32 to vector<16x1xf32>
    %172 = arith.divf %170, %171 : vector<16x1xf32>
    %173 = arith.mulf %167, %167 : vector<16x1xf32>
    %174 = arith.subf %172, %173 : vector<16x1xf32>
    %cst_80 = arith.constant 0.000000e+00 : f32
    %175 = vector.broadcast %cst_80 : f32 to vector<16x1xf32>
    %176 = arith.maximumf %174, %175 : vector<16x1xf32>
    %177 = vector.broadcast %167 : vector<16x1xf32> to vector<16x32xf32>
    %178 = arith.subf %163, %177 : vector<16x32xf32>
    %cst_81 = arith.constant 9.99999974E-6 : f32
    %179 = vector.broadcast %cst_81 : f32 to vector<16x1xf32>
    %180 = arith.addf %176, %179 : vector<16x1xf32>
    %181 = math.rsqrt %180 : vector<16x1xf32>
    %182 = vector.broadcast %181 : vector<16x1xf32> to vector<16x32xf32>
    %183 = arith.mulf %178, %182 : vector<16x32xf32>
    %184 = vector.broadcast %37 : vector<1x32xf32> to vector<16x32xf32>
    %185 = arith.mulf %183, %184 : vector<16x32xf32>
    %186 = vector.broadcast %39 : vector<1x32xf32> to vector<16x32xf32>
    %187 = arith.addf %185, %186 : vector<16x32xf32>
    %cst_82 = arith.constant 0.000000e+00 : f32
    %188 = vector.broadcast %cst_82 : f32 to vector<16x32xf32>
    %189 = arith.cmpf oge, %187, %188 : vector<16x32xf32>
    %cst_83 = arith.constant 0.00999999977 : f32
    %190 = vector.broadcast %cst_83 : f32 to vector<16x32xf32>
    %191 = arith.mulf %190, %187 : vector<16x32xf32>
    %192 = arith.select %189, %187, %191 : vector<16x32xi1>, vector<16x32xf32>
    %193 = vector.shape_cast %192 : vector<16x32xf32> to vector<1x16x32xf32>
    %194 = vector.shape_cast %5 : vector<16x1xi1> to vector<1x16x1xi1>
    %195 = vector.broadcast %194 : vector<1x16x1xi1> to vector<1x16x32xi1>
    %196 = arith.select %195, %14, %193 : vector<1x16x32xi1>, vector<1x16x32xf32>
    %197 = vector.shape_cast %196 : vector<1x16x32xf32> to vector<16x32xf32>
    %cst_84 = arith.constant dense<0.000000e+00> : vector<16x96xf32>
    %198 = tpu.matmul %197, %41, %cst_84 {dimension_numbers = #tpu.dot_dimension_numbers<[1], [0], [0], [1], [0, 0, 1, 1], [], []>} : vector<16x32xf32>, vector<32x96xf32>, vector<16x96xf32> -> vector<16x96xf32>
    %199 = vector.broadcast %43 : vector<1x96xf32> to vector<16x96xf32>
    %200 = arith.addf %198, %199 : vector<16x96xf32>
    %201 = vector.extract_strided_slice %200 {offsets = [0, 32], sizes = [16, 32], strides = [1, 1]} : vector<16x96xf32> to vector<16x32xf32>
    %202 = vector.extract_strided_slice %200 {offsets = [0, 64], sizes = [16, 32], strides = [1, 1]} : vector<16x96xf32> to vector<16x32xf32>
    %203 = vector.shape_cast %202 : vector<16x32xf32> to vector<1x16x32xf32>
    %204 = vector.extract_strided_slice %200 {offsets = [0, 0], sizes = [16, 32], strides = [1, 1]} : vector<16x96xf32> to vector<16x32xf32>
    %205 = vector.shape_cast %204 : vector<16x32xf32> to vector<1x16x32xf32>
    %206 = vector.extract_strided_slice %205 {offsets = [0, 8, 0], sizes = [1, 1, 32], strides = [1, 1, 1]} : vector<1x16x32xf32> to vector<1x1x32xf32>
    %207 = vector.shape_cast %206 : vector<1x1x32xf32> to vector<1x1x32xf32>
    %208 = vector.broadcast %207 : vector<1x1x32xf32> to vector<1x16x32xf32>
    %209 = vector.shape_cast %208 : vector<1x16x32xf32> to vector<16x32xf32>
    %210 = arith.mulf %201, %209 : vector<16x32xf32>
    %cst_85 = arith.constant dense<0.000000e+00> : vector<16x4xf32>
    %211 = tpu.matmul %210, %6, %cst_85 {dimension_numbers = #tpu.dot_dimension_numbers<[1], [0], [0], [1], [0, 0, 1, 1], [], []>} : vector<16x32xf32>, vector<32x4xf32>, vector<16x4xf32> -> vector<16x4xf32>
    %212 = vector.shape_cast %211 : vector<16x4xf32> to vector<1x16x4xf32>
    %cst_86 = arith.constant 0.000000e+00 : f32
    %213 = vector.broadcast %cst_86 : f32 to vector<1x16x1xf32>
    %214 = arith.cmpf ogt, %9, %213 : vector<1x16x1xf32>
    %cst_87 = arith.constant -1.000000e+30 : f32
    %215 = vector.shape_cast %214 : vector<1x16x1xi1> to vector<1x16x1xi1>
    %216 = vector.broadcast %215 : vector<1x16x1xi1> to vector<1x16x4xi1>
    %217 = vector.broadcast %cst_87 : f32 to vector<1x16x4xf32>
    %218 = arith.select %216, %217, %212 : vector<1x16x4xi1>, vector<1x16x4xf32>
    %cst_88 = arith.constant dense<0xFF800000> : vector<1x4xf32>
    %219 = vector.multi_reduction <maximumf>, %218, %cst_88 [1] : vector<1x16x4xf32> to vector<1x4xf32>
    %220 = vector.shape_cast %219 : vector<1x4xf32> to vector<1x1x4xf32>
    %221 = vector.broadcast %220 : vector<1x1x4xf32> to vector<1x16x4xf32>
    %222 = arith.subf %218, %221 : vector<1x16x4xf32>
    %223 = math.exp %222 : vector<1x16x4xf32>
    %cst_89 = arith.constant dense<0.000000e+00> : vector<1x4xf32>
    %224 = vector.multi_reduction <add>, %223, %cst_89 [1] : vector<1x16x4xf32> to vector<1x4xf32>
    %225 = vector.shape_cast %224 : vector<1x4xf32> to vector<1x1x4xf32>
    %226 = vector.broadcast %225 : vector<1x1x4xf32> to vector<1x16x4xf32>
    %227 = arith.divf %223, %226 : vector<1x16x4xf32>
    %228 = vector.shape_cast %227 : vector<1x16x4xf32> to vector<16x4xf32>
    %cst_90 = arith.constant dense<0.000000e+00> : vector<16x32xf32>
    %229 = tpu.matmul %228, %7, %cst_90 {dimension_numbers = #tpu.dot_dimension_numbers<[1], [0], [0], [1], [0, 0, 1, 1], [], []>} : vector<16x4xf32>, vector<4x32xf32>, vector<16x32xf32> -> vector<16x32xf32>
    %230 = vector.shape_cast %229 : vector<16x32xf32> to vector<1x16x32xf32>
    %231 = arith.mulf %230, %203 : vector<1x16x32xf32>
    %cst_91 = arith.constant dense<0.000000e+00> : vector<1x32xf32>
    %232 = vector.multi_reduction <add>, %231, %cst_91 [1] : vector<1x16x32xf32> to vector<1x32xf32>
    %cst_92 = arith.constant dense<0.000000e+00> : vector<1x32xf32>
    %233 = tpu.matmul %232, %45, %cst_92 {dimension_numbers = #tpu.dot_dimension_numbers<[1], [0], [0], [1], [0, 0, 1, 1], [], []>} : vector<1x32xf32>, vector<32x32xf32>, vector<1x32xf32> -> vector<1x32xf32>
    %234 = arith.addf %233, %47 : vector<1x32xf32>
    %cst_93 = arith.constant 0.000000e+00 : f32
    %235 = vector.broadcast %cst_93 : f32 to vector<1x32xf32>
    %236 = arith.cmpf oge, %234, %235 : vector<1x32xf32>
    %cst_94 = arith.constant 0.00999999977 : f32
    %237 = vector.broadcast %cst_94 : f32 to vector<1x32xf32>
    %238 = arith.mulf %237, %234 : vector<1x32xf32>
    %239 = arith.select %236, %234, %238 : vector<1x32xi1>, vector<1x32xf32>
    %240 = vector.shape_cast %239 : vector<1x32xf32> to vector<1x1x32xf32>
    %241 = vector.broadcast %10 : vector<1x16x1xf32> to vector<1x16x32xf32>
    %242 = arith.mulf %193, %241 : vector<1x16x32xf32>
    %243 = vector.shape_cast %5 : vector<16x1xi1> to vector<1x16x1xi1>
    %244 = vector.broadcast %243 : vector<1x16x1xi1> to vector<1x16x32xi1>
    %245 = vector.shape_cast %240 : vector<1x1x32xf32> to vector<1x1x32xf32>
    %246 = vector.broadcast %245 : vector<1x1x32xf32> to vector<1x16x32xf32>
    %247 = arith.select %244, %246, %242 : vector<1x16x32xi1>, vector<1x16x32xf32>
    %c0_95 = arith.constant 0 : index
    %c0_96 = arith.constant 0 : index
    %c0_97 = arith.constant 0 : index
    %248 = vector.load %arg23[%c0_95, %c0_96, %c0_97] : memref<1x16x32xf32, #tpu.memory_space<vmem>>, vector<1x16x32xf32>
    tpu.vector_store %arg23[%c0_95, %c0_96, %c0_97], %247 {strides = array<i32>} : memref<1x16x32xf32, #tpu.memory_space<vmem>>, vector<1x16x32xf32>,
    return
  }
  func.func @transform_0(%arg0: i32, %arg1: i32) -> (i32, i32, i32) {
    %c0_i32 = arith.constant 0 : i32
    %c0_i32_0 = arith.constant 0 : i32
    %c0_i32_1 = arith.constant 0 : i32
    return %arg0, %c0_i32, %c0_i32_0 : i32, i32, i32
  }
  func.func @transform_1(%arg0: i32, %arg1: i32) -> (i32, i32, i32) {
    %c0_i32 = arith.constant 0 : i32
    %c0_i32_0 = arith.constant 0 : i32
    %c0_i32_1 = arith.constant 0 : i32
    return %arg0, %c0_i32, %c0_i32_0 : i32, i32, i32
  }
  func.func @transform_2(%arg0: i32, %arg1: i32) -> (i32, i32) {
    %c0_i32 = arith.constant 0 : i32
    %c0_i32_0 = arith.constant 0 : i32
    %c0_i32_1 = arith.constant 0 : i32
    return %c0_i32, %c0_i32_0 : i32, i32
  }
  func.func @transform_3(%arg0: i32, %arg1: i32) -> (i32, i32) {
    %c0_i32 = arith.constant 0 : i32
    %c0_i32_0 = arith.constant 0 : i32
    %c0_i32_1 = arith.constant 0 : i32
    return %c0_i32, %c0_i32_0 : i32, i32
  }
  func.func @transform_4(%arg0: i32, %arg1: i32) -> (i32, i32) {
    %c0_i32 = arith.constant 0 : i32
    %c0_i32_0 = arith.constant 0 : i32
    %c0_i32_1 = arith.constant 0 : i32
    return %c0_i32, %c0_i32_0 : i32, i32
  }
  func.func @transform_5(%arg0: i32, %arg1: i32) -> (i32, i32, i32) {
    %c0_i32 = arith.constant 0 : i32
    %c0_i32_0 = arith.constant 0 : i32
    %c0_i32_1 = arith.constant 0 : i32
    return %arg1, %c0_i32, %c0_i32_0 : i32, i32, i32
  }
  func.func @transform_6(%arg0: i32, %arg1: i32) -> (i32, i32, i32) {
    %c0_i32 = arith.constant 0 : i32
    %c0_i32_0 = arith.constant 0 : i32
    %c0_i32_1 = arith.constant 0 : i32
    return %arg1, %c0_i32, %c0_i32_0 : i32, i32, i32
  }
  func.func @transform_7(%arg0: i32, %arg1: i32) -> (i32, i32, i32) {
    %c0_i32 = arith.constant 0 : i32
    %c0_i32_0 = arith.constant 0 : i32
    %c0_i32_1 = arith.constant 0 : i32
    return %arg1, %c0_i32, %c0_i32_0 : i32, i32, i32
  }
  func.func @transform_8(%arg0: i32, %arg1: i32) -> (i32, i32, i32) {
    %c0_i32 = arith.constant 0 : i32
    %c0_i32_0 = arith.constant 0 : i32
    %c0_i32_1 = arith.constant 0 : i32
    return %arg1, %c0_i32, %c0_i32_0 : i32, i32, i32
  }
  func.func @transform_9(%arg0: i32, %arg1: i32) -> (i32, i32, i32) {
    %c0_i32 = arith.constant 0 : i32
    %c0_i32_0 = arith.constant 0 : i32
    %c0_i32_1 = arith.constant 0 : i32
    return %arg1, %c0_i32, %c0_i32_0 : i32, i32, i32
  }
  func.func @transform_10(%arg0: i32, %arg1: i32) -> (i32, i32, i32) {
    %c0_i32 = arith.constant 0 : i32
    %c0_i32_0 = arith.constant 0 : i32
    %c0_i32_1 = arith.constant 0 : i32
    return %arg1, %c0_i32, %c0_i32_0 : i32, i32, i32
  }
  func.func @transform_11(%arg0: i32, %arg1: i32) -> (i32, i32, i32) {
    %c0_i32 = arith.constant 0 : i32
    %c0_i32_0 = arith.constant 0 : i32
    %c0_i32_1 = arith.constant 0 : i32
    return %arg1, %c0_i32, %c0_i32_0 : i32, i32, i32
  }
  func.func @transform_12(%arg0: i32, %arg1: i32) -> (i32, i32, i32) {
    %c0_i32 = arith.constant 0 : i32
    %c0_i32_0 = arith.constant 0 : i32
    %c0_i32_1 = arith.constant 0 : i32
    return %arg1, %c0_i32, %c0_i32_0 : i32, i32, i32
  }
  func.func @transform_13(%arg0: i32, %arg1: i32) -> (i32, i32, i32) {
    %c0_i32 = arith.constant 0 : i32
    %c0_i32_0 = arith.constant 0 : i32
    %c0_i32_1 = arith.constant 0 : i32
    return %arg1, %c0_i32, %c0_i32_0 : i32, i32, i32
  }
  func.func @transform_14(%arg0: i32, %arg1: i32) -> (i32, i32, i32) {
    %c0_i32 = arith.constant 0 : i32
    %c0_i32_0 = arith.constant 0 : i32
    %c0_i32_1 = arith.constant 0 : i32
    return %arg1, %c0_i32, %c0_i32_0 : i32, i32, i32
  }
  func.func @transform_15(%arg0: i32, %arg1: i32) -> (i32, i32, i32) {
    %c0_i32 = arith.constant 0 : i32
    %c0_i32_0 = arith.constant 0 : i32
    %c0_i32_1 = arith.constant 0 : i32
    return %arg1, %c0_i32, %c0_i32_0 : i32, i32, i32
  }
  func.func @transform_16(%arg0: i32, %arg1: i32) -> (i32, i32, i32) {
    %c0_i32 = arith.constant 0 : i32
    %c0_i32_0 = arith.constant 0 : i32
    %c0_i32_1 = arith.constant 0 : i32
    return %arg1, %c0_i32, %c0_i32_0 : i32, i32, i32
  }
  func.func @transform_17(%arg0: i32, %arg1: i32) -> (i32, i32, i32) {
    %c0_i32 = arith.constant 0 : i32
    %c0_i32_0 = arith.constant 0 : i32
    %c0_i32_1 = arith.constant 0 : i32
    return %arg1, %c0_i32, %c0_i32_0 : i32, i32, i32
  }
  func.func @transform_18(%arg0: i32, %arg1: i32) -> (i32, i32, i32) {
    %c0_i32 = arith.constant 0 : i32
    %c0_i32_0 = arith.constant 0 : i32
    %c0_i32_1 = arith.constant 0 : i32
    return %arg1, %c0_i32, %c0_i32_0 : i32, i32, i32
  }
  func.func @transform_19(%arg0: i32, %arg1: i32) -> (i32, i32, i32) {
    %c0_i32 = arith.constant 0 : i32
    %c0_i32_0 = arith.constant 0 : i32
    %c0_i32_1 = arith.constant 0 : i32
    return %arg1, %c0_i32, %c0_i32_0 : i32, i32, i32
  }
  func.func @transform_20(%arg0: i32, %arg1: i32) -> (i32, i32, i32) {
    %c0_i32 = arith.constant 0 : i32
    %c0_i32_0 = arith.constant 0 : i32
    %c0_i32_1 = arith.constant 0 : i32
    return %arg1, %c0_i32, %c0_i32_0 : i32, i32, i32
  }
  func.func @transform_21(%arg0: i32, %arg1: i32) -> (i32, i32, i32) {
    %c0_i32 = arith.constant 0 : i32
    %c0_i32_0 = arith.constant 0 : i32
    %c0_i32_1 = arith.constant 0 : i32
    return %arg0, %c0_i32, %c0_i32_0 : i32, i32, i32
  }
}

</mosaic_0001>

<bundles_post_ra>
// kernel: tpu_custom_call.1
= control target key start
LH: loop header
LB: loop body
LE: loop exit
PB: predicated region body
PF: predicated region fallthrough
CT: control target
= control target key end

     0   :  { %s4637_s0 = inlined_call_operand.vmem [shape: f32[2,16,2], index: 0, kind: input, shape index: {}]   ;;  %s4638_s1 = inlined_call_operand.hbm [shape: f32[2,16,32], index: 1, kind: input, shape index: {}]   ;;  %s4639_s2 = inlined_call_operand.vmem [shape: f32[16,4], index: 2, kind: input, shape index: {}]   ;;  %s4640_s3 = inlined_call_operand.vmem [shape: f32[32,4], index: 3, kind: input, shape index: {}]   ;;  %s4641_s4 = inlined_call_operand.hbm [shape: f32[4,32], index: 4, kind: input, shape index: {}]   ;;  %s4642_s5 = inlined_call_operand.vmem [shape: f32[2,32,64], index: 5, kind: input, shape index: {}]   ;;  %s4643_s6 = inlined_call_operand.hbm [shape: f32[2,1,64], index: 6, kind: input, shape index: {}]   ;;  %s4644_s7 = inlined_call_operand.vmem [shape: f32[2,64,32], index: 7, kind: input, shape index: {}]   ;;  %s4645_s8 = inlined_call_operand.hbm [shape: f32[2,1,32], index: 8, kind: input, shape index: {}]   ;;  %s4646_s9 = inlined_call_operand.hbm [shape: f32[2,1,32], index: 9, kind: input, shape index: {}]   ;;  %s4647_s10 = inlined_call_operand.hbm [shape: f32[2,1,32], index: 10, kind: input, shape index: {}]   ;;  %s4648_s11 = inlined_call_operand.vmem [shape: f32[2,32,96], index: 11, kind: input, shape index: {}]   ;;  %s4649_s12 = inlined_call_operand.vmem [shape: f32[2,1,96], index: 12, kind: input, shape index: {}]   ;;  %s4650_s13 = inlined_call_operand.vmem [shape: f32[2,32,32], index: 13, kind: input, shape index: {}]   ;;  %s4651_s14 = inlined_call_operand.vmem [shape: f32[2,1,32], index: 14, kind: input, shape index: {}]   ;;  %s4652_s15 = inlined_call_operand.vmem [shape: f32[2,1,32], index: 15, kind: input, shape index: {}]   ;;  %s4653_s16 = inlined_call_operand.vmem [shape: f32[2,1,32], index: 16, kind: input, shape index: {}]   ;;  %s4654_s17 = inlined_call_operand.vmem [shape: f32[2,32,96], index: 17, kind: input, shape index: {}]   ;;  %s4655_s18 = inlined_call_operand.vmem [shape: f32[2,1,96], index: 18, kind: input, shape index: {}]   ;;  %s4656_s19 = inlined_call_operand.hbm [shape: f32[2,32,32], index: 19, kind: input, shape index: {}]   ;;  %s4657_s20 = inlined_call_operand.vmem [shape: f32[2,1,32], index: 20, kind: input, shape index: {}]   ;;  %s4658_s21 = inlined_call_operand.hbm [shape: f32[2,16,32], index: 21, kind: output, shape index: {}]  }
   0x1   :  { %4696 = sst [smem:[#allocation32_spill]] %s4637_s0 }
   0x2   :  { %4697 = sst [smem:[#allocation33_spill]] %s4638_s1 }
   0x3   :  { %4698 = sst [smem:[#allocation34_spill]] %s4639_s2 }
   0x4   :  { %4699 = sst [smem:[#allocation35_spill]] %s4640_s3 }
   0x5   :  { %4700 = sst [smem:[#allocation36_spill]] %s4641_s4 }
   0x6   :  { %4701 = sst [smem:[#allocation37_spill]] %s4642_s5 }
   0x7   :  { %4702 = sst [smem:[#allocation38_spill]] %s4643_s6 }
   0x8   :  { %4703 = sst [smem:[#allocation39_spill]] %s4644_s7 }
   0x9   :  { %4704 = sst [smem:[#allocation40_spill]] %s4645_s8 }
   0xa   :  { %4705 = sst [smem:[#allocation41_spill]] %s4646_s9 }
   0xb   :  { %4706 = sst [smem:[#allocation42_spill]] %s4647_s10 }
   0xc   :  { %4707 = sst [smem:[#allocation43_spill]] %s4648_s11 }
   0xd   :  { %4708 = sst [smem:[#allocation44_spill]] %s4649_s12 }
   0xe   :  { %4709 = sst [smem:[#allocation45_spill]] %s4650_s13 }
   0xf   :  { %4710 = sst [smem:[#allocation46_spill]] %s4651_s14 }
  0x10   :  { %4711 = sst [smem:[#allocation47_spill]] %s4652_s15 }
  0x11   :  { %4712 = sst [smem:[#allocation48_spill]] %s4653_s16 }
  0x12   :  { %4713 = sst [smem:[#allocation49_spill]] %s4654_s17 }
  0x13   :  { %4714 = sst [smem:[#allocation50_spill]] %s4655_s18 }
  0x14   :  { %4715 = sst [smem:[#allocation51_spill]] %s4656_s19 }
  0x15   :  { %4716 = sst [smem:[#allocation52_spill]] %s4657_s20 }
  0x16   :  { %4717 = sst [smem:[#allocation53_spill]] %s4658_s21 }
  0x17   :  { %26 = vsyncpa [#allocation3], 0 }
  0x18   :  { %28 = vsyncpa [#allocation3 + $0x1], 0 }
  0x19   :  { %29 = vsyncpa [#allocation6], 0 }
  0x1a   :  { %30 = vsyncpa [#allocation4], 0 }
  0x1b   :  { %32 = vsyncpa [#allocation4 + $0x1], 0  ;;  %s3784_s2 = smov 0   ;;  %s3786_s25 = smov 0  }
  0x1c   :  { %s3788_s26 = smov 0   ;;  %s3790_s27 = smov 0  }
  0x1d   :  { %s3792_s3 = smov 0   ;;  %s3794_s28 = smov 0  }
  0x1e   :  { %s3796_s29 = smov 0   ;;  %s3798_s0 = smov 0  }
  0x1f   :  { %s3800_s4 = smov 0   ;;  %s3802_s30 = smov 0  }
  0x20   :  { %s3804_s5 = smov 0  }
  0x21 LB: > { %4718 = sst [smem:[#allocation17_spill]] %s3613_s25  ;;  %p4664_p0 = scmp.ne.s32.totalorder %s3629_s28, %s3625_s3  ;;  %s3649_s5 = sphi %s3804_s5, %s38_s5   ;;  %s3645_s30 = sphi %s3802_s30, %s4812_s30   ;;  %s3641_s4 = sphi %s3800_s4, %s4811_s4   ;;  %s3637_s0 = sphi %s3798_s0, %s4810_s0   ;;  %s3633_s29 = sphi %s3796_s29, %s4809_s29   ;;  %s3629_s28 = sphi %s3794_s28, %s4808_s28   ;;  %s3625_s3 = sphi %s3792_s3, %s4807_s3   ;;  %s3621_s27 = sphi %s3790_s27, %s4806_s27   ;;  %s3617_s26 = sphi %s3788_s26, %s4805_s26   ;;  %s3613_s25 = sphi %s3786_s25, %s4804_s25   ;;  %s3609_s2 = sphi %s3784_s2, %s4803_s2  }
  0x22   : > { %4719 = sst [smem:[#allocation18_spill]] %s3617_s26  ;;  %p91_p1 = scmp.eq.s32.totalorder %s3649_s5, 0 }
  0x23   : > { %4720 = sst [smem:[#allocation19_spill]] %s3621_s27  ;;  %p4665_p2 = scmp.lt.s32.totalorder %s3649_s5, 4 }
  0x24   : > { %4721 = sst [smem:[#allocation20_spill]] %s3625_s3  ;;  %p92_p3 = por %p91_p1, %p4664_p0 }
  0x25   : > { %4722 = sst [smem:[#allocation21_spill]] %s3629_s28  ;;  %s650_s1 = sand.u32 1, %s3649_s5  }
  0x26   : > { %4723 = sst [smem:[#allocation22_spill]] %s3633_s29  ;;  %s652_s24 = sand.u32 1, %s3629_s28  }
  0x27   : > { %4724 = sst [smem:[#allocation23_spill]] %s3641_s4  ;;  %s2768_s21 = sshll.u32 %s652_s24, 4 }
  0x28   : > { %4725 = sst [smem:[#allocation24_spill]] %s3645_s30  ;;  %s2843_s20 = sshll.u32 %s3645_s30, 8 }
  0x29   : > { %4726 = sst [smem:[#allocation25_spill]] %s3649_s5  ;;  %s4727_s16 = sld [smem:[#allocation33_spill]] }
  0x2a   : > { %s654_s23 = scalar_lea.vmem [#allocation2], %s2768_s21  ;;  %p3860_p4 = pnand %p4665_p2, %p92_p3 }
  0x2b   : > { %s661_s22 = sshll.u32 %s654_s23, 4  ;;  %s3866_s24 = scalar_lea.sflag [#allocation3], %s650_s1  ;;  %s3864_s22 = int_to_ptr.vmem [resolvable:$true] %s661_s22 }
  0x2c   : > { %p3313_p6 = pneg %p3860_p4 }
  0x2f   : > { %s3856_s15 = scalar_lea.hbm %s4727_s16, %s2843_s20  ;;  %s3316_s21 = scalar_lea.hbm %s4727_s16, 512 }
  0x30   : > { %s3311_s17 = scalar_lea.hbm %s3856_s15, 256  ;;  %p3317_p9 = scmp.lt.u32.totalorder %s3856_s15, %s4727_s16 }
  0x31   : > { %p3312_p5 = scmp.ne.s32.totalorder %s3856_s15, %s3311_s17  ;;  %p3318_p10 = scmp.lt.u32.totalorder %s3316_s21, %s3311_s17 }
  0x32   : > { %p3320_p12 = scmp.lt.u32.totalorder %s3311_s17, %s3856_s15 }
  0x33   : > { %p3314_p7 = pnand %p3313_p6, %p3312_p5  ;;  %p3319_p11 = por %p3318_p10, %p3317_p9 }
  0x35   : > { %p3315_p8 = pneg %p3314_p7  ;;  %p3321_p13 = por %p3320_p12, %p3319_p11 }
  0x37   : > { %p3322_p3 = pnand %p3321_p13, %p3315_p8 }
  0x39   : > { %3325 = shalt.err (!%p3322_p3)
}
  0x3a   : > { %s3326_s1 = scalar_lea.vmem %s3864_s22, 256  ;;  %s3651_s18 = smov [#allocation2]  }
  0x3b   : > { %p3327_p5 = scmp.ne.s32.totalorder %s3864_s22, %s3326_s1  ;;  %s3331_s20 = sshll.u32 %s3651_s18, 4  ;;  %s3332_s20 = int_to_ptr.vmem [resolvable:$false] %s3331_s20 }
  0x3c   : > { %s3333_s13 = scalar_lea.vmem %s3332_s20, 512  ;;  %p3334_p2 = scmp.lt.s32.totalorder %s3864_s22, %s3332_s20 }
  0x3d   : > { %p3329_p7 = pnand %p3327_p5, %p3313_p6  ;;  %p3335_p9 = scmp.lt.s32.totalorder %s3333_s13, %s3326_s1 }
  0x3f   : > { %p3330_p0 = pneg %p3329_p7  ;;  %p3336_p10 = por %p3335_p9, %p3334_p2 }
  0x41   : > { %p3337_p11 = pnand %p3336_p10, %p3330_p0 }
  0x43   : > { %3340 = shalt.err (!%p3337_p11)
}
  0x44   : > { %s4666_s17 = smov 128   ;;  %s4667_s21 = smov 8  }
  0x45   : > { %3140 = dma.hbm_to_vmem [thread:$0]  (!%p3860_p4), %s3856_s15, 256, %s3864_s22, %s3866_s24, %s4666_s17, %s4666_s17, %s4667_s21  }
  0x46   : > { %s47_s23 = sadd.s32 1, %s3641_s4  ;;  %s198_s1 = sadd.s32 1, %s3617_s26 }
  0x47   : > { %p48_p0 = scmp.ge.s32.totalorder %s47_s23, 2  ;;  %p205_p2 = scmp.ne.s32.totalorder %s3617_s26, %s3613_s25 }
  0x48   : > { %s3902_s18 = sand.u32 1, %s3617_s26   ;;  %s3905_s20 = sshll.u32 %s3641_s4, 4 }
  0x49   : > { %s4814_s23 = smov (%p48_p0, %s47_s23), 0  ;;  %s4730_s14 = sadd.s32 1, %s3645_s30 }
  0x4a   : > { %4729 = sst [smem:[#allocation26_spill]] %s4814_s23  ;;  %s4816_s14 = smov (!%p48_p0, %s4730_s14), %s3645_s30 }
  0x4b   : > { %s195_s15 = ssub.s32 %s3641_s4, %s4814_s23  ;;  %p207_p4 = por %p205_p2, %p91_p1 }
  0x4c   : > { %p52_p6 = scmp.ge.s32.totalorder %s4816_s14, 2  ;;  %p196_p8 = scmp.eq.s32.totalorder %s195_s15, 0 }
  0x4d   : > { %s4731_s6 = sld [smem:[#allocation38_spill]]  ;;  %s682_s12 = scalar_lea.vmem [#allocation7], %s3902_s18 }
  0x4e   : > { %s4818_s14 = smov (%p52_p6, %s4816_s14), 0  ;;  %s689_s23 = sshll.u32 %s682_s12, 4  ;;  %s3930_s23 = int_to_ptr.vmem [resolvable:$true] %s689_s23 }
  0x4f   : > { %4732 = sst [smem:[#allocation27_spill]] %s4818_s14  ;;  %s80_s16 = ssub.s32 %s3645_s30, %s4818_s14 }
  0x50   : > { %s3925_s21 = scalar_select %p196_p8, %s3617_s26, %s198_s1  }
  0x51   : > { %p81_p1 = scmp.eq.s32.totalorder %s80_s16, 0  ;;  %p4734_p12 = scmp.lt.s32.totalorder %s3649_s5, 4 }
  0x52   : > { %4733 = sst [smem:[#allocation28_spill]] %s3925_s21  ;;  %s4736_s22 = sadd.s32 1, %s3629_s28 }
  0x53   : > { %s3920_s17 = scalar_lea.hbm %s4731_s6, %s3905_s20  ;;  %p3934_p13 = pnand %p4734_p12, %p207_p4 }
  0x54   : > { %s3941_s13 = scalar_select %p81_p1, %s3629_s28, %s4736_s22  }
  0x55   : > { %s4735_s15 = scalar_select %p3934_p13, 1, 0 }
  0x56   : > { %4737 = sst [smem:[#allocation29_spill]] %s3941_s13  ;;  %s4738_s8 = sld [smem:[#allocation40_spill]] }
  0x57   : > { %s3341_s14 = scalar_lea.hbm %s3920_s17, 16  ;;  %p3953_p5 = pneg %p3934_p13 }
  0x58   : > { %p3342_p3 = scmp.ne.s32.totalorder %s3920_s17, %s3341_s14  ;;  %s3346_s22 = scalar_lea.hbm %s4731_s6, 32 }
  0x59   : > { %p3347_p10 = scmp.lt.u32.totalorder %s3920_s17, %s4731_s6  ;;  %p3348_p11 = scmp.lt.u32.totalorder %s3346_s22, %s3341_s14 }
  0x5a   : > { %p3344_p7 = pnand %p3953_p5, %p3342_p3  ;;  %p3350_p2 = scmp.lt.u32.totalorder %s3341_s14, %s3920_s17 }
  0x5b   : > { %p3349_p0 = por %p3348_p11, %p3347_p10 }
  0x5c   : > { %s3947_s1 = scalar_lea.hbm %s4738_s8, %s3905_s20  ;;  %p3345_p9 = pneg %p3344_p7 }
  0x5d   : > { %p3351_p4 = por %p3350_p2, %p3349_p0 }
  0x5f   : > { %p3352_p6 = pnand %p3351_p4, %p3345_p9 }
  0x61   : > { %3355 = shalt.err (!%p3352_p6)
}
  0x62   : > { %s3356_s7 = scalar_lea.vmem %s3930_s23, 16  ;;  %s3654_s11 = smov [#allocation7]  }
  0x63   : > { %p3357_p8 = scmp.ne.s32.totalorder %s3930_s23, %s3356_s7  ;;  %s3361_s30 = sshll.u32 %s3654_s11, 4  ;;  %s3362_s30 = int_to_ptr.vmem [resolvable:$false] %s3361_s30 }
  0x64   : > { %s3363_s21 = scalar_lea.vmem %s3362_s30, 32  ;;  %p3364_p3 = scmp.lt.s32.totalorder %s3930_s23, %s3362_s30 }
  0x65   : > { %p3359_p1 = pnand %p3357_p8, %p3953_p5  ;;  %p3365_p7 = scmp.lt.s32.totalorder %s3363_s21, %s3356_s7 }
  0x67   : > { %p3360_p12 = pneg %p3359_p1  ;;  %p3366_p10 = por %p3365_p7, %p3364_p3 }
  0x69   : > { %p3367_p11 = pnand %p3366_p10, %p3360_p12 }
  0x6b   : > { %3370 = shalt.err (!%p3367_p11)
}
  0x6c   : > { %3143 = dma.hbm_to_vmem [thread:$0]  (!%p3934_p13), %s3920_s17, 16, %s3930_s23, %s3866_s24  }
  0x6d   : > { %s707_s14 = scalar_lea.vmem [#allocation8], %s3902_s18  ;;  %s4740_s9 = sld [smem:[#allocation41_spill]] }
  0x6e   : > { %s714_s13 = sshll.u32 %s707_s14, 4  ;;  %s3371_s11 = scalar_lea.hbm %s3947_s1, 16  ;;  %s715_s13 = int_to_ptr.vmem [resolvable:$true] %s714_s13 }
  0x6f   : > { %p3372_p9 = scmp.ne.s32.totalorder %s3947_s1, %s3371_s11  ;;  %s3376_s6 = scalar_lea.hbm %s4738_s8, 32 }
  0x70   : > { %p3377_p4 = scmp.lt.u32.totalorder %s3947_s1, %s4738_s8  ;;  %p3378_p6 = scmp.lt.u32.totalorder %s3376_s6, %s3371_s11 }
  0x71   : > { %p3374_p0 = pnand %p3372_p9, %p3953_p5  ;;  %p3380_p1 = scmp.lt.u32.totalorder %s3371_s11, %s3947_s1 }
  0x72   : > { %p3379_p8 = por %p3378_p6, %p3377_p4 }
  0x73   : > { %s3982_s7 = scalar_lea.hbm %s4740_s9, %s3905_s20  ;;  %p3375_p2 = pneg %p3374_p0 }
  0x74   : > { %p3381_p12 = por %p3380_p1, %p3379_p8 }
  0x76   : > { %p3382_p3 = pnand %p3381_p12, %p3375_p2 }
  0x78   : > { %3385 = shalt.err (!%p3382_p3)
}
  0x79   : > { %s3386_s17 = scalar_lea.vmem %s715_s13, 16  ;;  %s3655_s23 = smov [#allocation8]  }
  0x7a   : > { %p3387_p7 = scmp.ne.s32.totalorder %s715_s13, %s3386_s17  ;;  %s3391_s14 = sshll.u32 %s3655_s23, 4  ;;  %s3392_s14 = int_to_ptr.vmem [resolvable:$false] %s3391_s14 }
  0x7b   : > { %s3393_s16 = scalar_lea.vmem %s3392_s14, 32  ;;  %p3394_p9 = scmp.lt.s32.totalorder %s715_s13, %s3392_s14 }
  0x7c   : > { %p3389_p10 = pnand %p3387_p7, %p3953_p5  ;;  %p3395_p0 = scmp.lt.s32.totalorder %s3393_s16, %s3386_s17 }
  0x7e   : > { %p3390_p11 = pneg %p3389_p10  ;;  %p3396_p13 = por %p3395_p0, %p3394_p9 }
  0x80   : > { %p3397_p4 = pnand %p3396_p13, %p3390_p11 }
  0x82   : > { %3400 = shalt.err (!%p3397_p4)
}
  0x83   : > { %p4741_p6 = scmp.ne.s32.totalorder %s4735_s15, 0  ;;  %s724_s6 = scalar_lea.vmem [#allocation9], %s3902_s18 }
  0x84   : > { %s731_s26 = sshll.u32 %s724_s6, 4  ;;  %s4742_s10 = sld [smem:[#allocation42_spill]]  ;;  %s732_s26 = int_to_ptr.vmem [resolvable:$true] %s731_s26 }
  0x85   : > { %3146 = dma.hbm_to_vmem [thread:$0]  (!%p4741_p6), %s3947_s1, 16, %s715_s13, %s3866_s24  }
  0x86   : > { %s3401_s30 = scalar_lea.hbm %s3982_s7, 16  ;;  %s3406_s23 = scalar_lea.hbm %s4740_s9, 32 }
  0x87   : > { %p3402_p13 = scmp.ne.s32.totalorder %s3982_s7, %s3401_s30  ;;  %p3407_p1 = scmp.lt.u32.totalorder %s3982_s7, %s4740_s9 }
  0x88   : > { %p3408_p12 = scmp.lt.u32.totalorder %s3406_s23, %s3401_s30  ;;  %p3410_p7 = scmp.lt.u32.totalorder %s3401_s30, %s3982_s7 }
  0x89   : > { %p3404_p2 = pnand %p3402_p13, %p3953_p5 }
  0x8a   : > { %s4007_s11 = scalar_lea.hbm %s4742_s10, %s3905_s20  ;;  %p3409_p3 = por %p3408_p12, %p3407_p1 }
  0x8b   : > { %p3405_p8 = pneg %p3404_p2 }
  0x8c   : > { %p3411_p10 = por %p3410_p7, %p3409_p3 }
  0x8e   : > { %p3412_p11 = pnand %p3411_p10, %p3405_p8 }
  0x90   : > { %3415 = shalt.err (!%p3412_p11)
}
  0x91   : > { %s3416_s20 = scalar_lea.vmem %s732_s26, 16  ;;  %s3656_s1 = smov [#allocation9]  }
  0x92   : > { %p3417_p9 = scmp.ne.s32.totalorder %s732_s26, %s3416_s20  ;;  %s3421_s13 = sshll.u32 %s3656_s1, 4  ;;  %s3422_s13 = int_to_ptr.vmem [resolvable:$false] %s3421_s13 }
  0x93   : > { %s3423_s6 = scalar_lea.vmem %s3422_s13, 32  ;;  %p3424_p13 = scmp.lt.s32.totalorder %s732_s26, %s3422_s13 }
  0x94   : > { %p3419_p0 = pnand %p3417_p9, %p3953_p5  ;;  %p3425_p2 = scmp.lt.s32.totalorder %s3423_s6, %s3416_s20 }
  0x96   : > { %p3420_p4 = pneg %p3419_p0  ;;  %p3426_p6 = por %p3425_p2, %p3424_p13 }
  0x98   : > { %p3427_p1 = pnand %p3426_p6, %p3420_p4 }
  0x9a   : > { %3430 = shalt.err (!%p3427_p1)
}
  0x9b   : > { %p4743_p12 = scmp.ne.s32.totalorder %s4735_s15, 0  ;;  %s741_s29 = scalar_lea.vmem [#allocation10], %s3902_s18 }
  0x9c   : > { %s748_s22 = sshll.u32 %s741_s29, 4  ;;  %s3431_s30 = scalar_lea.hbm %s4007_s11, 16  ;;  %s749_s22 = int_to_ptr.vmem [resolvable:$true] %s748_s22 }
  0x9d   : > { %3149 = dma.hbm_to_vmem [thread:$0]  (!%p4743_p12), %s3982_s7, 16, %s732_s26, %s3866_s24  }
  0x9e   : > { %p3432_p8 = scmp.ne.s32.totalorder %s4007_s11, %s3431_s30  ;;  %s3436_s23 = scalar_lea.hbm %s4742_s10, 32 }
  0x9f   : > { %p3437_p7 = scmp.lt.u32.totalorder %s4007_s11, %s4742_s10  ;;  %p3438_p10 = scmp.lt.u32.totalorder %s3436_s23, %s3431_s30 }
  0xa0   : > { %p3434_p3 = pnand %p3432_p8, %p3953_p5  ;;  %p3440_p9 = scmp.lt.u32.totalorder %s3431_s30, %s4007_s11 }
  0xa1   : > { %p3439_p11 = por %p3438_p10, %p3437_p7 }
  0xa2   : > { %p3435_p6 = pneg %p3434_p3 }
  0xa3   : > { %p3441_p0 = por %p3440_p9, %p3439_p11 }
  0xa5   : > { %p3442_p4 = pnand %p3441_p0, %p3435_p6 }
  0xa7   : > { %3445 = shalt.err (!%p3442_p4)
}
  0xa8   : > { %s3446_s7 = scalar_lea.vmem %s749_s22, 16  ;;  %s3657_s26 = smov [#allocation10]  }
  0xa9   : > { %p3447_p13 = scmp.ne.s32.totalorder %s749_s22, %s3446_s7  ;;  %s3451_s20 = sshll.u32 %s3657_s26, 4  ;;  %s3452_s20 = int_to_ptr.vmem [resolvable:$false] %s3451_s20 }
  0xaa   : > { %s3453_s1 = scalar_lea.vmem %s3452_s20, 32  ;;  %p3454_p8 = scmp.lt.s32.totalorder %s749_s22, %s3452_s20 }
  0xab   : > { %p3449_p2 = pnand %p3447_p13, %p3953_p5  ;;  %p3455_p3 = scmp.lt.s32.totalorder %s3453_s1, %s3446_s7 }
  0xad   : > { %p3450_p1 = pneg %p3449_p2  ;;  %p3456_p12 = por %p3455_p3, %p3454_p8 }
  0xaf   : > { %p3457_p7 = pnand %p3456_p12, %p3450_p1 }
  0xb1   : > { %3460 = shalt.err (!%p3457_p7)
}
  0xb2   : > { %p4744_p10 = scmp.ne.s32.totalorder %s4735_s15, 0  ;;  %s4047_s13 = sadd.s32 4294967295, %s3649_s5  }
  0xb3   : > { %s2764_s6 = sadd.s32 4294967294, %s3649_s5   ;;  %p96_p12 = scmp.ne.s32.totalorder %s3625_s3, %s3621_s27 }
  0xb4   : > { %3152 = dma.hbm_to_vmem [thread:$0]  (!%p4744_p10), %s4007_s11, 16, %s749_s22, %s3866_s24  }
  0xb5   : > { %p4677_p6 = scmp.eq.s32.totalorder %s4047_s13, 0  ;;  %p211_p11 = scmp.ne.s32.totalorder %s3613_s25, %s3609_s2 }
  0xb6   : > { %p599_p9 = scmp.eq.s32.totalorder %s4047_s13, 3  ;;  %p605_p4 = scmp.eq.s32.totalorder %s2764_s6, 3 }
  0xb7   : > { %p4058_p0 = por %p4677_p6, %p96_p12  ;;  %p4064_p13 = por %p211_p11, %p4677_p6 }
  0xb8   : > { %p4747_p2 = scmp.ne.s32.totalorder %s3629_s28, %s3625_s3  ;;  %p4075_p8 = por %p605_p4, %p96_p12 }
  0xb9   : > { %s4745_s29 = scalar_select %p4058_p0, 1, 0 }
  0xba   : > { %s4746_s11 = scalar_select %p4064_p13, 1, 0 }
  0xbb   : > { %p4071_p1 = por %p599_p9, %p4747_p2  ;;  %p2765_p3 = scmp.ge.s32.totalorder %s3649_s5, 1 }
  0xbc   : > { %s4750_s2 = scalar_select %p4075_p8, 1, 0 }
  0xbd   : > { %s4748_s22 = scalar_select %p4071_p1, 1, 0 }
  0xbe   : > { %4751 = sst [smem:[#allocation31_spill]] %s4750_s2  ;;  %p612_p7 = scmp.lt.s32.totalorder %s3649_s5, 5 }
  0xbf   : > { %4749 = sst [smem:[#allocation30_spill]] %s4748_s22  ;;  %s2775_s30 = sshll.u32 %s3902_s18, 5 }
  0xc0   : > { %p4082_p0 = pnand %p2765_p3, %p612_p7  ;;  %s3658_s17 = smov [#allocation5]  }
  0xc1   : > { %s631_s23 = sshll.u32 %s3658_s17, 4  ;;  %s2844_s14 = sshll.u32 %s3641_s4, 9  ;;  %s4086_s23 = int_to_ptr.vmem [resolvable:$true] %s631_s23 }
  0xc2   : > { %s4752_s21 = scalar_select %p4082_p0, 1, 0 }
  0xc3   : > { %p3133_p11 = pneg %p4082_p0  ;;  %s4753_s19 = sld [smem:[#allocation51_spill]] }
  0xc4   : > { %s813_s18 = scalar_lea.vmem [#allocation11], %s2775_s30 }
  0xc5   : > { %s820_s20 = sshll.u32 %s813_s18, 4  ;;  %p4098_p12 = pnand %p3133_p11, %p4677_p6  ;;  %s4102_s20 = int_to_ptr.vmem [resolvable:$true] %s820_s20 }
  0xc7   : > { %s4754_s1 = scalar_select %p4098_p12, 1, 0 }
  0xc9   : > { %s4094_s26 = scalar_lea.hbm %s4753_s19, %s2844_s14  ;;  %s3466_s16 = scalar_lea.hbm %s4753_s19, 1024 }
  0xca   : > { %s3461_s6 = scalar_lea.hbm %s4094_s26, 512  ;;  %p3467_p3 = scmp.lt.u32.totalorder %s4094_s26, %s4753_s19 }
  0xcb   : > { %p3462_p9 = scmp.ne.s32.totalorder %s4094_s26, %s3461_s6  ;;  %p3468_p7 = scmp.lt.u32.totalorder %s3466_s16, %s3461_s6 }
  0xcc   : > { %p3470_p6 = scmp.lt.u32.totalorder %s3461_s6, %s4094_s26 }
  0xcd   : > { %p3464_p4 = pnand %p3462_p9, %p3953_p5  ;;  %p3469_p11 = por %p3468_p7, %p3467_p3 }
  0xcf   : > { %p3465_p2 = pneg %p3464_p4  ;;  %p3471_p8 = por %p3470_p6, %p3469_p11 }
  0xd1   : > { %p3472_p1 = pnand %p3471_p8, %p3465_p2 }
  0xd3   : > { %3475 = shalt.err (!%p3472_p1)
}
  0xd4   : > { %s3476_s30 = scalar_lea.vmem %s4102_s20, 512  ;;  %s3659_s18 = smov [#allocation11]  }
  0xd5   : > { %p3477_p9 = scmp.ne.s32.totalorder %s4102_s20, %s3476_s30  ;;  %s3481_s17 = sshll.u32 %s3659_s18, 4  ;;  %s3482_s17 = int_to_ptr.vmem [resolvable:$false] %s3481_s17 }
  0xd6   : > { %s3483_s8 = scalar_lea.vmem %s3482_s17, 1024  ;;  %p3484_p0 = scmp.lt.s32.totalorder %s4102_s20, %s3482_s17 }
  0xd7   : > { %p3479_p4 = pnand %p3477_p9, %p3953_p5  ;;  %p3485_p12 = scmp.lt.s32.totalorder %s3483_s8, %s3476_s30 }
  0xd9   : > { %p3480_p13 = pneg %p3479_p4  ;;  %p3486_p3 = por %p3485_p12, %p3484_p0 }
  0xdb   : > { %p3487_p7 = pnand %p3486_p3, %p3480_p13 }
  0xdd   : > { %3490 = shalt.err (!%p3487_p7)
}
  0xde   : > { %s4755_s6 = smov 8   ;;  %s4756_s14 = smov 128  }
  0xdf   : > { %3155 = dma.hbm_to_vmem [thread:$0]  (!%p4744_p10), %s4094_s26, 512, %s4102_s20, %s3866_s24, %s4756_s14, %s4756_s14, %s4755_s6  }
  0xe0   : > { %s4757_s7 = sld [smem:[#allocation36_spill]]  ;;  %p4758_p6 = scmp.ne.s32.totalorder %s4754_s1, 0 }
  0xe2   : > { %p3493_p0 = pneg %p4758_p6 }
  0xe6   : > { %s3491_s18 = scalar_lea.hbm %s4757_s7, 64 }
  0xe7   : > { %p3492_p5 = scmp.ne.s32.totalorder %s4757_s7, %s3491_s18  ;;  %p3498_p8 = scmp.lt.u32.totalorder %s3491_s18, %s4757_s7 }
  0xe9   : > { %p3494_p13 = pnand %p3493_p0, %p3492_p5 }
  0xeb   : > { %p3495_p1 = pneg %p3494_p13 }
  0xed   : > { %p3500_p12 = pnand %p3498_p8, %p3495_p1 }
  0xef   : > { %3503 = shalt.err (!%p3500_p12)
}
  0xf0   : > { %s3504_s24 = scalar_lea.vmem %s4086_s23, 64  ;;  %p3512_p9 = scmp.lt.s32.totalorder %s4086_s23, %s4086_s23 }
  0xf1   : > { %p3505_p10 = scmp.ne.s32.totalorder %s4086_s23, %s3504_s24  ;;  %p3513_p4 = scmp.lt.s32.totalorder %s3504_s24, %s3504_s24 }
  0xf3   : > { %p3507_p2 = pnand %p3505_p10, %p3493_p0  ;;  %p3514_p3 = por %p3513_p4, %p3512_p9 }
  0xf5   : > { %p3508_p11 = pneg %p3507_p2 }
  0xf7   : > { %p3515_p7 = pnand %p3514_p3, %p3508_p11 }
  0xf9   : > { %3518 = shalt.err (!%p3515_p7)
}
  0xfa   : > { %3136 = dma.hbm_to_vmem [thread:$0]  (!%p4758_p6), %s4757_s7, 64, %s4086_s23, [#allocation6]  }
  0xfb   : > { %p4759_p5 = scmp.ne.s32.totalorder %s4752_s21, 0 }
  0xfc   : > { %s840_s20 = sand.u32 (!%p4759_p5), 1, %s4047_s13   ;;  %s4682_s8 = sand.u32 (!%p4759_p5), 1, %s3625_s3  }
  0xfd   : > { %838 = sbr.rel (%p4759_p5) target bundleno = 3473 (0xd91), region = 104  ;;  %s4156_s6 = sshll.u32 (!%p4759_p5), %s4682_s8, 4 }
  0xfe   : > { %s841_s14 = scalar_lea.sflag (!%p4759_p5), [#allocation3], %s840_s20  ;;  %p4760_p0 = scmp.ne.s32.totalorder (!%p4759_p5), %s4745_s29, 0 }
 0x104   : > { %3592 = dma.done.wait (%p4760_p0), %s841_s14, 256  }
 0x105   : > { %3594 = vsyncadd (%p4760_p0), %s841_s14, 4294967040  ;;  %p4761_p6 = scmp.eq.s32.totalorder %s4047_s13, 0 }
 0x107   : > { %3596 = dma.done.wait (%p4761_p6), [#allocation6], 64   ;;  %p4762_p13 = pmov %p4761_p6 }
 0x108   : > { %s4168_s21 = sand.u32 1, %s3613_s25   ;;  %p4763_p1 = scmp.ne.s32.totalorder %s4746_s11, 0 }
 0x109   : > { %3598 = vsyncadd (%p4762_p13), [#allocation6], 4294967232 }
 0x10a   : > { %3600 = dma.done.wait (%p4763_p1), %s841_s14, 576  }
 0x10b   : > { %3602 = vsyncadd (%p4763_p1), %s841_s14, 4294966720  ;;  %s4764_s29 = sld [smem:[#allocation22_spill]]  ;;  %p1017_p8 = scmp.lt.s32.totalorder %s3637_s0, 1  ;;  %v4217_v6 = vld [vmem:[#allocation5] sm:$0xf] }
 0x10c   : > { %s4765_s15 = sld [smem:[#allocation32_spill]]  ;;  %s4766_s26 = sld [smem:[#allocation34_spill]] }
 0x10d   : > { %s1018_s12 = scalar_select %p1017_p8, %s3637_s0, 1 }
 0x10e   : > { %s4768_s1 = sld [smem:[#allocation35_spill]]  ;;  %s4769_s14 = sld [smem:[#allocation37_spill]] }
 0x10f   : > { %s2845_s16 = sshll.u32 %s1018_s12, 4  ;;  %s4770_s23 = sld [smem:[#allocation39_spill]] }
 0x110   : > { %s4777_s19 = sld [smem:[#allocation49_spill]]  ;;  %s4779_s2 = sld [smem:[#allocation52_spill]] }
 0x111   : > { %p1022_p12 = scmp.lt.s32.totalorder %s4764_s29, 1  ;;  %s864_s18 = scalar_lea.vmem [#allocation8], %s4168_s21 }
 0x112   : > { %s1021_s30 = scalar_lea.vmem %s4765_s15, %s2845_s16  ;;  %s4767_s20 = smov %s4766_s26  ;;  %v4185_v0 = vld [vmem:[%s4766_s26] sm:$0xff] }
 0x113   : > { %v4190_v1 = vld [vmem:[%s4767_s20 + $0x8] sm:$0xff]  ;;  %s4198_s12 = scalar_select %p1022_p12, %s4764_s29, 1  ;;  %vm1067_vm0 = vcmp.gt.f32.partialorder %v4185_v0, 0.5  ;;  %v4219_v7 = vld [vmem:[%s1021_s30] sm:$0xff] }
 0x114   : > { %v4195_v2 = vld [vmem:[%s4768_s1] sm:$0xff]  ;;  %vm1068_vm1 = vcmp.gt.f32.partialorder %v4190_v1, 0.5  ;;  %v4205_v3 = vld [vmem:[%s4768_s1 + $0x8] sm:$0xff]  ;;  %v4210_v4 = vld [vmem:[%s4768_s1 + $0x10] sm:$0xff]  ;;  %s4773_s26 = sld [smem:[#allocation45_spill]]  ;;  %s4776_s15 = sld [smem:[#allocation48_spill]] }
 0x115   : > { %v4215_v5 = vld [vmem:[%s4768_s1 + $0x18] sm:$0xff]  ;;  %v4221_v8 = vld [vmem:[%s1021_s30 + $0x8] sm:$0xff]  ;;  %s2846_s24 = sshll.u32 %s4198_s12, 5  ;;  %s2847_s9 = sshll.u32 %s4198_s12, 6 }
 0x116   : > { %s4228_s16 = scalar_lea.vmem %s4769_s14, %s2846_s24  ;;  %s4233_s17 = scalar_lea.vmem %s4770_s23, %s2847_s9 }
 0x117   : > { %s4771_s1 = sld [smem:[#allocation43_spill]]  ;;  %s4264_s7 = scalar_lea.vmem %s4777_s19, %s2846_s24 }
 0x118   : > { %s1064_s14 = scalar_lea.vmem %s4779_s2, %s4198_s12  ;;  %s872_s9 = scalar_lea.vmem [#allocation9], %s4168_s21 }
 0x119   : > { %s880_s8 = scalar_lea.vmem [#allocation10], %s4168_s21  ;;  %s4780_s23 = sshll.u32 %s4168_s21, 5 }
 0x11a   : > { %s4247_s11 = scalar_lea.vmem %s4773_s26, %s2846_s24  ;;  %s1053_s5 = scalar_lea.vmem %s4776_s15, %s4198_s12 }
 0x11b   : > { %s4778_s26 = sld [smem:[#allocation50_spill]]  ;;  %s4279_s27 = scalar_lea.vmem [#allocation11], %s4780_s23 }
 0x11c   : > { %s4282_s13 = scalar_lea.vmem [#allocation12], %s4156_s6  ;;  %p2795_p10 = scmp.ne.s32.totalorder %s4764_s29, 0 }
 0x11d   : > { %s4238_s30 = scalar_lea.vmem %s4771_s1, %s2846_s24  ;;  %v3660_v9 = vmov (!%p2795_p10), 2   ;;  %v3661_v10 = vmov (!%p2795_p10), 0   ;;  %s4781_s3 = scalar_lea.vmem (!%p2795_p10), [#allocation2], %s4156_s6  ;;  %vm1082_vm2 = vcmask (!%p2795_p10), 261120  }
 0x11e   : > { %1079 = sbr.rel (%p2795_p10) target bundleno = 422 (0x1a6), region = 136  ;;  %3268 = vset.pattern.permute.xlu0 (!%p2795_p10), %v3660_v9  ;;  %v1093_v11 = vsel (!%p2795_p10), %vm1067_vm0, 1, %v3661_v10  ;;  %v1094_v12 = vsel (!%p2795_p10), %vm1068_vm1, 1, %v3661_v10  ;;  %v1080_v13 = vld [vmem:[%s4781_s3] sm:$0xff] (!%p2795_p10)  ;;  %s4782_s22 = smov (!%p2795_p10), %s4781_s3 }
 0x11f   : > { %1096 = vperm.xlu0 (!%p2795_p10), %3268, %v1093_v11   ;;  %v1081_v14 = vld [vmem:[%s4782_s22 + $0x8] sm:$0xff] (!%p2795_p10)  ;;  %v1083_v15 = vsel (!%p2795_p10), %vm1082_vm2, %v1080_v13, 0.0 }
 0x120   : > { %v1084_v16 = vsel (!%p2795_p10), %vm1082_vm2, %v1081_v14, 0.0 }
 0x121   : > { %s1061_s20 = scalar_lea.vmem %s4778_s26, %s4198_s12  ;;  %v1085_v17 = vadd.f32 (!%p2795_p10), %v1084_v16, %v1083_v15 }
 0x123   : > { %1099 = vperm.xlu0 (!%p2795_p10), %3268, %v1094_v12   ;;  %v1086_v18 = vrot.slane (!%p2795_p10), %v1085_v17, 4 }
 0x125   : > { %v1087_v19 = vadd.f32 %v1086_v18, %v1085_v17 }
 0x127   : > { %v1088_v20 = vrot.slane %v1087_v19, 2 }
 0x129   : > { %v1089_v21 = vadd.f32 %v1088_v20, %v1087_v19 }
 0x12b   : > { %v1090_v22 = vrot.slane %v1089_v21, 1 }
 0x12d   : > { %v1091_v23 = vadd.f32 %v1090_v22, %v1089_v21 }
 0x12f   : > { %v1092_v24 = vmul.f32 0.125, %v1091_v23 }
 0x19e   : > { %v1097_v25 = vpop.permute.xlu0 %1096 }
 0x19f   : > { %vm1101_vm3 = vcmp.eq.s32.totalorder %v1097_v25, 1 }
 0x1a0   : > { %v1103_v26 = vsel %vm1101_vm3, %v1092_v24, %v1080_v13 }
 0x1a1   : > { %1105 = vst.msk [vmem:[%s4282_s13] sm:$0xff] %vm1082_vm2, %v1103_v26 }
 0x1a2   : > { %v1100_v27 = vpop.permute.xlu0 %1099 }
 0x1a3   : > { %vm1102_vm4 = vcmp.eq.s32.totalorder %v1100_v27, 1 }
 0x1a4   : > { %v1104_v28 = vsel %vm1102_vm4, %v1092_v24, %v1081_v14 }
 0x1a5   : > { %1106 = vst.msk [vmem:[%s4282_s13 + $0x8] sm:$0xff] %vm1082_vm2, %v1104_v28 }
 0x1a6 PF: > { %v1109_v29 = vld [vmem:[%s4228_s16] sm:$0xff]  ;;  %v1110_v30 = vld [vmem:[%s4228_s16 + $0x8] sm:$0xff]  ;;  %v1111_v31 = vld [vmem:[%s4228_s16 + $0x10] sm:$0xff]  ;;  %vm1153_vm5 = vcmask 261120   ;;  %s4783_s6 = scalar_lea.vmem [#allocation7], %s4168_s21  ;;  %vm1243_vm6 = vcmask 523264  }
 0x1a7   : > { %v3045_v32 = vpack.c.bf16 %v1110_v30, %v1109_v29  ;;  %v1112_v33 = vld [vmem:[%s4228_s16 + $0x18] sm:$0xff]  ;;  %v1114_v36 = vld [vmem:[%s4233_s17] sm:$0xff]  ;;  %v1115_v37 = vld [vmem:[%s4233_s17 + $0x8] sm:$0xff]  ;;  %v3662_v56 = vmov 2   ;;  %v3663_v15 = vmov 0   ;;  %s4784_s24 = sld [smem:[#allocation44_spill]] }
 0x1a8   : > { %v4304_v34 = vld [vmem:[%s4282_s13] sm:$0xff]  ;;  %v3049_v35 = vpack.c.bf16 %v1112_v33, %v1111_v31  ;;  %v3053_v39 = vpack.c.bf16 %v1115_v37, %v1114_v36  ;;  %3269 = vset.pattern.permute.xlu0 %v3662_v56  ;;  %3270 = vset.pattern.permute.xlu1 %v3662_v56  ;;  %v1377_v16 = vsel %vm1068_vm1, 1, %v3663_v15  ;;  %v1376_v17 = vsel %vm1067_vm0, 1, %v3663_v15  ;;  %s4786_s1 = sld [smem:[#allocation46_spill]]  ;;  %s4793_s3 = sld [smem:[#allocation20_spill]] }
 0x1a9   : > { %2929 = vmatprep.mubr.msk.f32.mxu0 %vm1153_vm5, %v4304_v34  ;;  %v1116_v38 = vld [vmem:[%s4233_s17 + $0x10] sm:$0xff]  ;;  %3046 = vmatprep.subr.bf16.mxu0 %v3045_v32  ;;  %v1117_v40 = vld [vmem:[%s4233_s17 + $0x18] sm:$0xff]  ;;  %v1118_v42 = vld [vmem:[%s4233_s17 + $0x20] sm:$0xff]  ;;  %vm1753_vm11 = vcmask 1043456   ;;  %vm1728_vm12 = vcmask 31744   ;;  %vm2204_vm15 = vcmp.gt.f32.partialorder %v4219_v7, 0.0 }
 0x1aa   : > { %3048 = vmatpush3.bf16.msra.mxu0 %v3045_v32  ;;  %v3057_v41 = vpack.c.bf16 %v1117_v40, %v1116_v38  ;;  %v1119_v43 = vld [vmem:[%s4233_s17 + $0x28] sm:$0xff]  ;;  %3054 = vmatprep.subr.bf16.mxu1 %v3053_v39  ;;  %v1120_v46 = vld [vmem:[%s4233_s17 + $0x30] sm:$0xff]  ;;  %v1121_v47 = vld [vmem:[%s4233_s17 + $0x38] sm:$0xff]  ;;  %s3665_s17 = smov 96   ;;  %vm2205_vm0 = vcmp.gt.f32.partialorder %v4221_v8, 0.0  ;;  %vm3669_vm3 = vmmov 0  }
 0x1ab   : > { %3050 = vmatprep.subr.bf16.mxu0 %v3049_v35  ;;  %3056 = vmatpush3.bf16.msra.mxu1 %v3053_v39  ;;  %v3061_v44 = vpack.c.bf16 %v1119_v43, %v1118_v42  ;;  %v3065_v48 = vpack.c.bf16 %v1121_v47, %v1120_v46  ;;  %v2796_v49 = vld [vmem:[%s4783_s6] ss:$0 sm:$0xff]  ;;  %v1126_v19 = vld [vmem:[%s4238_s30 + $0x8] sm:$0xff]  ;;  %v1127_v21 = vld [vmem:[%s4238_s30 + $0x10] sm:$0xff]  ;;  %s4794_s22 = sld [smem:[#allocation30_spill]]  ;;  %s2851_s6 = sshll.u32 %s3637_s0, 8 }
 0x1ac   : > { %3058 = vmatprep.subr.bf16.mxu1 %v3057_v41  ;;  %v4315_v45 = vld [vmem:[%s4282_s13 + $0x8] sm:$0xff]  ;;  %v2799_v57 = vld [vmem:[%s864_s18] ss:$0 sm:$0xff]  ;;  %s2455_s21 = sshll.u32 %s4282_s13, 4  ;;  %s4795_s29 = sld [smem:[#allocation53_spill]]  ;;  %s4564_s21 = int_to_ptr.vmem [resolvable:$true] %s2455_s21 }
 0x1ad   : > { %v1125_v18 = vld [vmem:[%s4238_s30] sm:$0xff]  ;;  %v1128_v22 = vld [vmem:[%s4238_s30 + $0x18] sm:$0xff]  ;;  %s4785_s16 = scalar_lea.vmem %s4784_s24, %s4198_s12  ;;  %s3666_s30 = smov 64  }
 0x1ae   : > { %3052 = vmatpush3.bf16.msra.mxu0 %v3049_v35  ;;  %v3069_v20 = vpack.c.bf16 %v1126_v19, %v1125_v18  ;;  %v3073_v23 = vpack.c.bf16 %v1128_v22, %v1127_v21  ;;  %v2802_v43 = vld [vmem:[%s872_s9] ss:$0 sm:$0xff]  ;;  %s4787_s15 = scalar_lea.vmem %s4786_s1, %s4198_s12  ;;  %s4797_s0 = sand.u32 1, %s4793_s3  }
 0x1af   : > { %3060 = vmatpush3.bf16.msra.mxu1 %v3057_v41 }
 0x1b0   : > { %3062 = vmatprep.subr.bf16.mxu1 %v3061_v44  ;;  %3070 = vmatprep.subr.bf16.mxu0 %v3069_v20 }
 0x1b1   : > { %2930 = vmatmul.mubr.msk.f32.vlgmr.msra.gmra.mrb[0].mxu0 %vm1153_vm5, %v4315_v45  ;;  %p4798_p11 = scmp.ne.s32.totalorder %s4794_s22, 0 }
 0x1b2   : > { %3072 = vmatpush3.bf16.msra.mxu0 %v3069_v20  ;;  %s4796_s24 = smov %s4795_s29 }
 0x1b3   : > { %3064 = vmatpush3.bf16.msra.mxu1 %v3061_v44  ;;  %3074 = vmatprep.subr.bf16.mxu0 %v3073_v23 }
 0x1b4   : > { %3066 = vmatprep.subr.bf16.mxu1 %v3065_v48 }
 0x1b6   : > { %3076 = vmatpush3.bf16.msra.mxu0 %v3073_v23 }
 0x1b7   : > { %3068 = vmatpush3.bf16.msra.mxu1 %v3065_v48 }
 0x1b8   : > { %2982 = vmatprep.subr.msk.mxu1 %vm1753_vm11, %v4217_v6 }
 0x284   : > { %v2931_v50 = vpop.f32.mrb[0].mxu0 }
 0x285   : > { %v1232_v51 = vadd.f32 %v2931_v50, %v2796_v49  ;;  %v1226_v52 = vpop.f32.mrb[1].mxu0  ;;  %v2803_v50 = vld [vmem:[%s880_s8] ss:$0 sm:$0xff]  ;;  %s3667_s8 = smov 32  }
 0x286   : > { %v1227_v53 = vadd.f32 %v2796_v49, %v1226_v52 }
 0x287   : > { %v1236_v55 = vmax.f32 %v1232_v51, 0.0 }
 0x288   : > { %v1235_v54 = vmax.f32 %v1227_v53, 0.0 }
 0x28a   : > { %2948 = vmatprep.mubr.msk.f32.mxu1 %vm1243_vm6, %v1235_v54 }
 0x28b   : > { %2949 = vmatmul.mubr.msk.f32.vlgmr.msra.gmra.mrb[0].mxu1 %vm1243_vm6, %v1236_v55 }
 0x28c   : > { %2983 = vmatpush3.msk.msra.mxu1 %vm1753_vm11, %v4217_v6 }
 0x35e   : > { %v2950_v58 = vpop.f32.mrb[0].mxu1 }
 0x35f   : > { %v1322_v59 = vadd.f32 %v2950_v58, %v2799_v57  ;;  %v1316_v60 = vpop.f32.mrb[1].mxu1  ;;  %v3664_v58 = vmov 1  }
 0x360   : > { %v1317_v61 = vadd.f32 %v2799_v57, %v1316_v60  ;;  %v1485_v60 = vlaneseq }
 0x361   : > { %v1326_v62 = vadd.f32 %v1322_v59, %v4315_v45  ;;  %v4366_v59 = vpack.c.bf16 %v4205_v3, %v4195_v2 }
 0x362   : > { %v1325_v63 = vadd.f32 %v1317_v61, %v4304_v34  ;;  %v4372_v61 = vpack.c.bf16 %v4215_v5, %v4210_v4 }
 0x363   : > { %v1337_v9 = vmul.f32 %v1326_v62, %v1326_v62  ;;  %v1330_v13 = vsel %vm1153_vm5, %v1326_v62, 0.0  ;;  %3078 = vmatprep.subr.bf16.mxu0 %v4366_v59 }
 0x364   : > { %v1327_v10 = vsel %vm1153_vm5, %v1325_v63, 0.0  ;;  %v1336_v12 = vmul.f32 %v1325_v63, %v1325_v63 }
 0x365   : > { %1328 = vadd.xlane.f32.xlu0 %v1327_v10  ;;  %v1341_v11 = vsel %vm1153_vm5, %v1337_v9, 0.0 }
 0x366   : > { %1342 = vadd.xlane.f32.xlu1 %v1341_v11  ;;  %v1338_v14 = vsel %vm1153_vm5, %v1336_v12, 0.0 }
 0x369   : > { %1331 = vadd.xlane.f32.xlu0 %v1330_v13 }
 0x36a   : > { %1339 = vadd.xlane.f32.xlu1 %v1338_v14 }
 0x37b   : > { %1382 = vperm.xlu1 %3270, %v1377_v16  }
 0x37f   : > { %1379 = vperm.xlu0 %3269, %v1376_v17   ;;  %3271 = vset.pattern.permute.xlu1 %v3663_v15 }
 0x380   : > { %1492 = vperm.xlu1 %3271, %v4185_v0  }
 0x383   : > { %3273 = vset.pattern.permute.xlu0 %v3663_v15 }
 0x384   : > { %1497 = vperm.xlu1 %3271, %v4190_v1  }
 0x388   : > { %3272 = vset.pattern.permute.xlu1 %v3664_v58 }
 0x3f2   : > { %v1329_v24 = vpop.xlane.xlu0 %1328 }
 0x3f3   : > { %v1343_v25 = vpop.xlane.xlu1 %1342  ;;  %v1334_v26 = vmul.f32 0.03125, %v1329_v24 }
 0x3f4   : > { %v1345_v32 = vmul.f32 0.03125, %v1343_v25 }
 0x3f5   : > { %v1346_v30 = vmul.f32 %v1334_v26, %v1334_v26  ;;  %v1352_v41 = vsub.f32 %v1325_v63, %v1334_v26  ;;  %v4379_v63 = vshrl.u32 %v1485_v60, 7 }
 0x3f6   : > { %v1332_v27 = vpop.xlane.xlu0 %1331 }
 0x3f7   : > { %v1335_v28 = vmul.f32 0.03125, %v1332_v27  ;;  %v1340_v29 = vpop.xlane.xlu1 %1339  ;;  %v4384_v11 = vsub.s32 0, %v4379_v63  ;;  %vm1487_vm9 = vcmp.lt.s32.totalorder %v4379_v63, 1  ;;  %vm1516_vm10 = vcmp.lt.s32.totalorder %v4379_v63, 7 }
 0x3f8   : > { %v1344_v31 = vmul.f32 0.03125, %v1340_v29 }
 0x3f9   : > { %v1347_v33 = vmul.f32 %v1335_v28, %v1335_v28  ;;  %v1353_v44 = vsub.f32 %v1326_v62, %v1335_v28  ;;  %v2804_v62 = vld [vmem:[%s4785_s16] ss:$0 sm:$0xff]  ;;  %s4562_s16 = scalar_lea.hbm %s4795_s29, %s2851_s6 }
 0x3fa   : > { %v1348_v35 = vsub.f32 %v1344_v31, %v1346_v30 }
 0x3fb   : > { %v1349_v36 = vsub.f32 %v1345_v32, %v1347_v33  ;;  %v4351_v51 = vpop.permute.xlu1 %1382 }
 0x3fc   : > { %v1350_v37 = vmax.f32 %v1348_v35, 0.0  ;;  %vm1385_vm8 = vcmp.eq.s32.totalorder %v4351_v51, 1 }
 0x3fd   : > { %v1351_v38 = vmax.f32 %v1349_v36, 0.0 }
 0x3fe   : > { %v1354_v39 = vadd.f32 1e-05, %v1350_v37  ;;  %v4347_v48 = vpop.permute.xlu0 %1379 }
 0x3ff   : > { %v1355_v40 = vadd.f32 1e-05, %v1351_v38  ;;  %vm1384_vm7 = vcmp.eq.s32.totalorder %v4347_v48, 1  ;;  %v4396_v5 = vpop.permute.xlu1 %1492 }
 0x400   : > { %3277 = vrsqrt.f32 %v1354_v39 }
 0x401   : > { %3279 = vrsqrt.f32 %v1355_v40 }
 0x403   : > { %v1498_v12 = vpop.permute.xlu1 %1497 }
 0x40a   : > { %v3278_v42 = vpop.eup %3277 }
 0x40b   : > { %v3280_v46 = vpop.eup %3279  ;;  %v1358_v47 = vmul.f32 %v3278_v42, %v1352_v41 }
 0x40c   : > { %v1359_v49 = vmul.f32 %v3280_v46, %v1353_v44 }
 0x40d   : > { %v1366_v52 = vmul.f32 %v2802_v43, %v1358_v47 }
 0x40e   : > { %v1367_v53 = vmul.f32 %v2802_v43, %v1359_v49 }
 0x40f   : > { %v1374_v54 = vadd.f32 %v2803_v50, %v1366_v52 }
 0x410   : > { %v1375_v55 = vadd.f32 %v2803_v50, %v1367_v53 }
 0x411   : > { %v1386_v56 = vsel %vm1384_vm7, %v4304_v34, %v1374_v54 }
 0x412   : > { %v1387_v57 = vsel %vm1385_vm8, %v4315_v45, %v1375_v55  ;;  %2959 = vmatprep.mubr.msk.f32.mxu0 %vm1153_vm5, %v1386_v56 }
 0x413   : > { %2960 = vmatmul.mubr.msk.f32.vlgmr.msra.gmra.mrb[2].mxu0 %vm1153_vm5, %v1387_v57 }
 0x414   : > { %3080 = vmatpush3.bf16.msra.mxu0 %v4366_v59 }
 0x415   : > { %3082 = vmatprep.subr.bf16.mxu0 %v4372_v61 }
 0x418   : > { %3084 = vmatpush3.bf16.msra.mxu0 %v4372_v61 }
 0x4e6   : > { %v2961_v2 = vpop.f32.mrb[2].mxu0 }
 0x4e7   : > { %v1472_v3 = vadd.f32 %v2961_v2, %v2804_v62  ;;  %v1466_v9 = vpop.f32.mrb[3].mxu0 }
 0x4e8   : > { %v1467_v10 = vadd.f32 %v2804_v62, %v1466_v9 }
 0x4e9   : > { %1479 = vrot.lane.b32.xlu1 %v1472_v3, %s3665_s17  ;;  %v1538_v4 = vrot.slane %v1472_v3, %v4384_v11 }
 0x4ea   : > { %1502 = vrot.lane.b32.xlu0 %v1467_v10, %s3666_s30 }
 0x4ed   : > { %1477 = vrot.lane.b32.xlu1 %v1467_v10, %s3665_s17 }
 0x4ee   : > { %1872 = vrot.lane.b32.xlu0 %v1538_v4, %s3666_s30 }
 0x4f1   : > { %1520 = vperm.xlu1 %3272, %v4185_v0  }
 0x4f5   : > { %1524 = vperm.xlu1 %3272, %v4190_v1  }
 0x4f9   : > { %1546 = vrot.lane.b32.xlu1 %v1538_v4, %s3665_s17 }
 0x4fa   : > { %3274 = vset.pattern.permute.xlu1 %v3663_v15 }
 0x4fd   : > { %1504 = vrot.lane.b32.xlu1 %v1472_v3, %s3666_s30 }
 0x55b   : > { %v1480_v13 = vpop.permute.xlu1 %1479 }
 0x55c   : > { %v1484_v16 = vrot.slane %v1480_v13, 7  ;;  %v1542_v23 = vmul.f32 %v1480_v13, %v1472_v3  ;;  %v1515_v25 = vrot.slane %v1480_v13, 1  ;;  %v4415_v37 = vpop.permute.xlu0 %1502 }
 0x55d   : > { %v1508_v40 = vrot.slane %v4415_v37, 7  ;;  %v1529_v41 = vrot.slane %v4415_v37, 1 }
 0x55f   : > { %v1478_v14 = vpop.permute.xlu1 %1477 }
 0x560   : > { %v1483_v17 = vrot.slane %v1478_v14, 7  ;;  %v1541_v22 = vmul.f32 %v1478_v14, %v1467_v10  ;;  %v1514_v24 = vrot.slane %v1478_v14, 1 }
 0x562   : > { %v1488_v0 = vsel %vm1487_vm9, %v1483_v17, %v1484_v16  ;;  %v1489_v1 = vsel %vm1487_vm9, %v1484_v16, %v1483_v17  ;;  %v1517_v26 = vsel %vm1516_vm10, %v1514_v24, %v1515_v25  ;;  %v1518_v30 = vsel %vm1516_vm10, %v1515_v25, %v1514_v24 }
 0x563   : > { %v1500_v18 = vmul.f32 %v4396_v5, %v1489_v1  ;;  %v1501_v19 = vmul.f32 %v1498_v12, %v1488_v0 }
 0x565   : > { %v1540_v20 = vmul.f32 %v1501_v19, %v1472_v3  ;;  %v1539_v21 = vmul.f32 %v1500_v18, %v1467_v10 }
 0x567   : > { %2970 = vmatprep.mubr.msk.f32.mxu0 %vm1153_vm5, %v1539_v21 }
 0x568   : > { %2971 = vmatmul.mubr.msk.f32.vlgmr.msra.gmra.mrb[4].mxu0 %vm1153_vm5, %v1540_v20 }
 0x569   : > { %2973 = vmatprep.mubr.msk.f32.mxu0 %vm1153_vm5, %v1541_v22 }
 0x56c   : > { %2974 = vmatmul.mubr.msk.f32.gmra.mrb[6].mxu0 %vm1153_vm5, %v1542_v23 }
 0x570   : > { %v1521_v27 = vpop.permute.xlu1 %1520 }
 0x571   : > { %v1527_v28 = vmul.f32 %v1521_v27, %v1517_v26 }
 0x573   : > { %v1543_v29 = vmul.f32 %v1527_v28, %v1467_v10 }
 0x574   : > { %v1525_v31 = vpop.permute.xlu1 %1524 }
 0x575   : > { %v1528_v32 = vmul.f32 %v1525_v31, %v1518_v30  ;;  %2976 = vmatprep.mubr.msk.f32.mxu0 %vm1153_vm5, %v1543_v29 }
 0x577   : > { %v1544_v33 = vmul.f32 %v1528_v32, %v1472_v3 }
 0x578   : > { %v1547_v35 = vpop.permute.xlu1 %1546 }
 0x579   : > { %v1549_v36 = vmul.f32 %v1547_v35, %v1467_v10  ;;  %2977 = vmatmul.mubr.msk.f32.gmra.mrb[8].mxu0 %vm1153_vm5, %v1544_v33  ;;  %v1550_v38 = vmul.f32 %v1547_v35, %v1472_v3 }
 0x57b   : > { %2979 = vmatprep.mubr.msk.f32.mxu0 %vm1153_vm5, %v1549_v36 }
 0x57c   : > { %v4418_v39 = vpop.permute.xlu1 %1504 }
 0x57d   : > { %v1509_v42 = vrot.slane %v4418_v39, 7  ;;  %v1530_v43 = vrot.slane %v4418_v39, 1  ;;  %2980 = vmatmul.mubr.msk.f32.gmra.mrb[10].mxu0 %vm1153_vm5, %v1550_v38 }
 0x57f   : > { %v1510_v44 = vsel %vm1487_vm9, %v1508_v40, %v1509_v42  ;;  %v1532_v46 = vsel %vm1516_vm10, %v1530_v43, %v1529_v41  ;;  %v1531_v47 = vsel %vm1516_vm10, %v1529_v41, %v1530_v43 }
 0x580   : > { %v4435_v49 = vmul.f32 %v1510_v44, %v1498_v12  ;;  %v4437_v50 = vmul.f32 %v1532_v46, %v1525_v31  ;;  %v4439_v52 = vmul.f32 %v1531_v47, %v1521_v27 }
 0x63b   : > { %v2972_v53 = vpop.f32.mrb[4].mxu0 }
 0x63c   : > { %v1641_v54 = vpop.f32.mrb[5].mxu0 }
 0x63f   : > { %v2975_v55 = vpop.f32.mrb[6].mxu0 }
 0x640   : > { %v1681_v56 = vmax.f32 %v2972_v53, %v2975_v55  ;;  %v1651_v57 = vpop.f32.mrb[7].mxu0 }
 0x641   : > { %v1680_v60 = vmax.f32 %v1641_v54, %v1651_v57 }
 0x64c   : > { %v2978_v62 = vpop.f32.mrb[8].mxu0 }
 0x64d   : > { %v1661_v2 = vpop.f32.mrb[9].mxu0 }
 0x650   : > { %v2981_v3 = vpop.f32.mrb[10].mxu0 }
 0x651   : > { %v1683_v9 = vmax.f32 %v2978_v62, %v2981_v3  ;;  %v1671_v10 = vpop.f32.mrb[11].mxu0 }
 0x652   : > { %v1682_v4 = vmax.f32 %v1661_v2, %v1671_v10 }
 0x653   : > { %v1685_v12 = vmax.f32 %v1681_v56, %v1683_v9 }
 0x654   : > { %v1684_v13 = vmax.f32 %v1680_v60, %v1682_v4  ;;  %v1130_v4 = vld [vmem:[%s4247_s11] sm:$0xff] }
 0x655   : > { %v1687_v14 = vsub.f32 %v2972_v53, %v1685_v12  ;;  %v1693_v16 = vsub.f32 %v2975_v55, %v1685_v12  ;;  %v1699_v17 = vsub.f32 %v2978_v62, %v1685_v12  ;;  %v1705_v0 = vsub.f32 %v2981_v3, %v1685_v12  ;;  %v1131_v12 = vld [vmem:[%s4247_s11 + $0x8] sm:$0xff] }
 0x656   : > { %v1686_v1 = vsub.f32 %v1641_v54, %v1684_v13  ;;  %v1692_v18 = vsub.f32 %v1651_v57, %v1684_v13  ;;  %v1698_v19 = vsub.f32 %v1661_v2, %v1684_v13  ;;  %v1704_v20 = vsub.f32 %v1671_v10, %v1684_v13 }
 0x657   : > { %v1690_v21 = vmul.f32 1.442695, %v1687_v14  ;;  %v1696_v22 = vmul.f32 1.442695, %v1693_v16  ;;  %v1702_v23 = vmul.f32 1.442695, %v1699_v17  ;;  %v3085_v13 = vpack.c.bf16 %v1131_v12, %v1130_v4 }
 0x658   : > { %v1708_v24 = vmul.f32 1.442695, %v1705_v0  ;;  %v1688_v25 = vmul.f32 1.442695, %v1686_v1  ;;  %v1694_v26 = vmul.f32 1.442695, %v1692_v18  ;;  %v1511_v0 = vsel %vm1487_vm9, %v1509_v42, %v1508_v40  ;;  %v1873_v42 = vpop.permute.xlu0 %1872 }
 0x659   : > { %3281 = vpow2.f32 %v1690_v21  ;;  %v1700_v27 = vmul.f32 1.442695, %v1698_v19  ;;  %v1706_v28 = vmul.f32 1.442695, %v1704_v20  ;;  %3086 = vmatprep.subr.bf16.mxu1 %v3085_v13  ;;  %v1132_v14 = vld [vmem:[%s4247_s11 + $0x10] sm:$0xff]  ;;  %v1133_v16 = vld [vmem:[%s4247_s11 + $0x18] sm:$0xff]  ;;  %v1512_v18 = vmul.f32 %v1511_v0, %v4396_v5 }
 0x65a   : > { %3283 = vpow2.f32 %v1696_v22  ;;  %v3089_v17 = vpack.c.bf16 %v1133_v16, %v1132_v14  ;;  %s3671_s11 = smov [#allocation12]  }
 0x65b   : > { %3285 = vpow2.f32 %v1702_v23  ;;  %s3523_s18 = sshll.u32 %s3671_s11, 4  ;;  %s3524_s18 = int_to_ptr.vmem [resolvable:$false] %s3523_s18 }
 0x65c   : > { %3287 = vpow2.f32 %v1708_v24  ;;  %s3525_s1 = scalar_lea.vmem %s3524_s18, 512  ;;  %p3526_p3 = scmp.lt.s32.totalorder %s4564_s21, %s3524_s18 }
 0x65d   : > { %3289 = vpow2.f32 %v1688_v25 }
 0x65e   : > { %3291 = vpow2.f32 %v1694_v26 }
 0x65f   : > { %3293 = vpow2.f32 %v1700_v27 }
 0x660   : > { %3295 = vpow2.f32 %v1706_v28 }
 0x663   : > { %v3282_v29 = vpop.eup %3281 }
 0x664   : > { %v3284_v30 = vpop.eup %3283 }
 0x665   : > { %v3286_v31 = vpop.eup %3285  ;;  %v1711_v32 = vadd.f32 %v3284_v30, %v3282_v29 }
 0x666   : > { %v3288_v33 = vpop.eup %3287 }
 0x667   : > { %v3290_v35 = vpop.eup %3289  ;;  %v1713_v36 = vadd.f32 %v3286_v31, %v1711_v32 }
 0x668   : > { %v3292_v38 = vpop.eup %3291 }
 0x669   : > { %v1715_v41 = vadd.f32 %v3288_v33, %v1713_v36  ;;  %v1710_v43 = vadd.f32 %v3292_v38, %v3290_v35  ;;  %v3294_v44 = vpop.eup %3293 }
 0x66a   : > { %v3296_v47 = vpop.eup %3295 }
 0x66b   : > { %3297 = vrcp.f32 %v1715_v41  ;;  %v1712_v46 = vadd.f32 %v3294_v44, %v1710_v43 }
 0x66d   : > { %v1714_v53 = vadd.f32 %v3296_v47, %v1712_v46 }
 0x66f   : > { %3299 = vrcp.f32 %v1714_v53  ;;  %v1138_v53 = vld [vmem:[%s4264_s7 + $0x8] sm:$0xff] }
 0x675   : > { %v3298_v54 = vpop.eup %3297 }
 0x676   : > { %v1721_v55 = vmul.f32 %v3298_v54, %v3282_v29  ;;  %v1723_v56 = vmul.f32 %v3298_v54, %v3284_v30  ;;  %v1725_v57 = vmul.f32 %v3298_v54, %v3286_v31  ;;  %v1727_v60 = vmul.f32 %v3298_v54, %v3288_v33  ;;  %v1139_v54 = vld [vmem:[%s4264_s7 + $0x10] sm:$0xff] }
 0x679   : > { %v3300_v62 = vpop.eup %3299 }
 0x67a   : > { %v1720_v2 = vmul.f32 %v3300_v62, %v3290_v35  ;;  %v1722_v3 = vmul.f32 %v3300_v62, %v3292_v38  ;;  %v1724_v9 = vmul.f32 %v3300_v62, %v3294_v44  ;;  %v1726_v10 = vmul.f32 %v3300_v62, %v3296_v47  ;;  %v1137_v47 = vld [vmem:[%s4264_s7] sm:$0xff] }
 0x67c   : > { %2984 = vmatprep.mubr.msk.f32.mxu1 %vm1728_vm12, %v1720_v2 }
 0x67d   : > { %2985 = vmatmul.mubr.msk.f32.vlgmr.msra.gmra.mrb[2].mxu1 %vm1728_vm12, %v1721_v55  ;;  %v3093_v55 = vpack.c.bf16 %v1138_v53, %v1137_v47 }
 0x67e   : > { %2987 = vmatprep.mubr.msk.f32.mxu1 %vm1728_vm12, %v1722_v3  ;;  %3088 = vmatpush3.bf16.msra.mxu1 %v3085_v13 }
 0x67f   : > { %3090 = vmatprep.subr.bf16.mxu1 %v3089_v17  ;;  %3094 = vmatprep.subr.bf16.mxu0 %v3093_v55 }
 0x680   : > { %3096 = vmatpush3.bf16.msra.mxu0 %v3093_v55 }
 0x681   : > { %2988 = vmatmul.mubr.msk.f32.gmra.mrb[4].mxu1 %vm1728_vm12, %v1723_v56  ;;  %v1140_v56 = vld [vmem:[%s4264_s7 + $0x18] sm:$0xff]  ;;  %s4788_s7 = sld [smem:[#allocation47_spill]] }
 0x682   : > { %2990 = vmatprep.mubr.msk.f32.mxu1 %vm1728_vm12, %v1724_v9  ;;  %3092 = vmatpush3.bf16.msra.mxu1 %v3089_v17 }
 0x683   : > { %3102 = vmatprep.subr.bf16.mxu1 %v4366_v59 }
 0x685   : > { %2991 = vmatmul.mubr.msk.f32.gmra.mrb[6].mxu1 %vm1728_vm12, %v1725_v57  ;;  %v3097_v57 = vpack.c.bf16 %v1140_v56, %v1139_v54 }
 0x686   : > { %2993 = vmatprep.mubr.msk.f32.mxu1 %vm1728_vm12, %v1726_v10 }
 0x687   : > { %3098 = vmatprep.subr.bf16.mxu0 %v3097_v57  ;;  %s4789_s28 = scalar_lea.vmem %s4788_s7, %s4198_s12 }
 0x688   : > { %3100 = vmatpush3.bf16.msra.mxu0 %v3097_v57 }
 0x689   : > { %2994 = vmatmul.mubr.msk.f32.gmra.mrb[8].mxu1 %vm1728_vm12, %v1727_v60 }
 0x750   : > { %v2986_v1 = vpop.f32.mrb[2].mxu1 }
 0x751   : > { %v1863_v19 = vmul.f32 %v2986_v1, %v4435_v49  ;;  %v1823_v20 = vpop.f32.mrb[3].mxu1 }
 0x752   : > { %v1862_v21 = vmul.f32 %v1823_v20, %v1512_v18 }
 0x754   : > { %v2989_v22 = vpop.f32.mrb[4].mxu1 }
 0x755   : > { %v1865_v23 = vmul.f32 %v2989_v22, %v4418_v39  ;;  %v1833_v24 = vpop.f32.mrb[5].mxu1 }
 0x756   : > { %v1864_v25 = vmul.f32 %v1833_v24, %v4415_v37  ;;  %v2824_v37 = vld [vmem:[%s4787_s15] ss:$0 sm:$0xff] }
 0x757   : > { %v1867_v26 = vadd.f32 %v1865_v23, %v1863_v19  ;;  %v2827_v23 = vld [vmem:[%s4789_s28] ss:$0 sm:$0xff] }
 0x758   : > { %v1866_v27 = vadd.f32 %v1864_v25, %v1862_v21  ;;  %v2992_v28 = vpop.f32.mrb[6].mxu1 }
 0x759   : > { %v1869_v29 = vmul.f32 %v2992_v28, %v4437_v50  ;;  %v1843_v63 = vpop.f32.mrb[7].mxu1 }
 0x75a   : > { %v1868_v40 = vmul.f32 %v1843_v63, %v4439_v52 }
 0x75b   : > { %v1871_v5 = vadd.f32 %v1869_v29, %v1867_v26 }
 0x75c   : > { %v1870_v49 = vadd.f32 %v1868_v40, %v1866_v27  ;;  %v2995_v30 = vpop.f32.mrb[8].mxu1  ;;  %v2828_v27 = vld [vmem:[%s1053_s5] ss:$0 sm:$0xff] }
 0x75d   : > { %v1876_v31 = vmul.f32 %v2995_v30, %v1873_v42  ;;  %v1853_v32 = vpop.f32.mrb[9].mxu1 }
 0x75e   : > { %v1875_v33 = vmul.f32 %v1873_v42, %v1853_v32 }
 0x75f   : > { %v1878_v39 = vadd.f32 %v1876_v31, %v1871_v5 }
 0x760   : > { %v1877_v35 = vadd.f32 %v1875_v33, %v1870_v49  ;;  %v2829_v33 = vld [vmem:[%s1061_s20] ss:$0 sm:$0xff] }
 0x762   : > { %3004 = vmatprep.mubr.msk.f32.mxu1 %vm1153_vm5, %v1877_v35 }
 0x763   : > { %3005 = vmatmul.mubr.msk.f32.vlgmr.msra.gmra.mrb[10].mxu1 %vm1153_vm5, %v1878_v39 }
 0x764   : > { %3104 = vmatpush3.bf16.msra.mxu1 %v4366_v59 }
 0x765   : > { %3106 = vmatprep.subr.bf16.mxu1 %v4372_v61 }
 0x768   : > { %3108 = vmatpush3.bf16.msra.mxu1 %v4372_v61 }
 0x769   : > { %3029 = vmatprep.subr.msk.mxu1 %vm1753_vm11, %v4217_v6 }
 0x836   : > { %v3006_v50 = vpop.f32.mrb[10].mxu1 }
 0x837   : > { %v1963_v52 = vadd.f32 %v3006_v50, %v2824_v37  ;;  %v1957_v36 = vpop.f32.mrb[11].mxu1 }
 0x838   : > { %v1958_v59 = vadd.f32 %v2824_v37, %v1957_v36 }
 0x839   : > { %v1969_v38 = vsel %vm1153_vm5, %v1963_v52, 0.0  ;;  %v1975_v43 = vmul.f32 %v1963_v52, %v1963_v52 }
 0x83a   : > { %1970 = vadd.xlane.f32.xlu0 %v1969_v38  ;;  %v1966_v61 = vsel %vm1153_vm5, %v1958_v59, 0.0  ;;  %v1974_v41 = vmul.f32 %v1958_v59, %v1958_v59  ;;  %v2207_v38 = vsel %vm2205_vm0, 1, %v3663_v15 }
 0x83b   : > { %1967 = vadd.xlane.f32.xlu1 %v1966_v61  ;;  %v1979_v46 = vsel %vm1153_vm5, %v1975_v43, 0.0 }
 0x83c   : > { %v1976_v44 = vsel %vm1153_vm5, %v1974_v41, 0.0 }
 0x83e   : > { %1977 = vadd.xlane.f32.xlu0 %v1976_v44 }
 0x83f   : > { %1980 = vadd.xlane.f32.xlu1 %v1979_v46 }
 0x8c7   : > { %v1971_v60 = vpop.xlane.xlu0 %1970 }
 0x8c8   : > { %v1968_v62 = vpop.xlane.xlu1 %1967  ;;  %v1973_v2 = vmul.f32 0.03125, %v1971_v60 }
 0x8c9   : > { %v1972_v3 = vmul.f32 0.03125, %v1968_v62 }
 0x8ca   : > { %v1985_v13 = vmul.f32 %v1973_v2, %v1973_v2  ;;  %v1991_v22 = vsub.f32 %v1963_v52, %v1973_v2  ;;  %v2206_v52 = vsel %vm2204_vm15, 1, %v3663_v15 }
 0x8cb   : > { %v1984_v9 = vmul.f32 %v1972_v3, %v1972_v3  ;;  %v1978_v10 = vpop.xlane.xlu0 %1977  ;;  %v1990_v20 = vsub.f32 %v1958_v59, %v1972_v3 }
 0x8cc   : > { %v1982_v4 = vmul.f32 0.03125, %v1978_v10  ;;  %v1981_v12 = vpop.xlane.xlu1 %1980 }
 0x8cd   : > { %v1983_v14 = vmul.f32 0.03125, %v1981_v12 }
 0x8ce   : > { %v1986_v16 = vsub.f32 %v1982_v4, %v1984_v9 }
 0x8cf   : > { %v1987_v17 = vsub.f32 %v1983_v14, %v1985_v13 }
 0x8d0   : > { %v1988_v0 = vmax.f32 %v1986_v16, 0.0 }
 0x8d1   : > { %v1989_v1 = vmax.f32 %v1987_v17, 0.0 }
 0x8d2   : > { %v1992_v18 = vadd.f32 1e-05, %v1988_v0 }
 0x8d3   : > { %v1993_v19 = vadd.f32 1e-05, %v1989_v1 }
 0x8d4   : > { %3301 = vrsqrt.f32 %v1992_v18 }
 0x8d5   : > { %3303 = vrsqrt.f32 %v1993_v19 }
 0x8de   : > { %v3302_v21 = vpop.eup %3301 }
 0x8df   : > { %v3304_v24 = vpop.eup %3303  ;;  %v1996_v25 = vmul.f32 %v3302_v21, %v1990_v20 }
 0x8e0   : > { %v1997_v26 = vmul.f32 %v3304_v24, %v1991_v22  ;;  %v1143_v24 = vld [vmem:[%s4279_s27 + $0x8] sm:$0xff] }
 0x8e1   : > { %v2004_v28 = vmul.f32 %v2827_v23, %v1996_v25 }
 0x8e2   : > { %v2005_v29 = vmul.f32 %v2827_v23, %v1997_v26  ;;  %v1142_v23 = vld [vmem:[%s4279_s27] sm:$0xff]  ;;  %v3668_v26 = vmov 0.0|0.0  }
 0x8e3   : > { %v2012_v63 = vadd.f32 %v2828_v27, %v2004_v28  ;;  %v3110_v25 = vpack.c.bf16 %v1143_v24, %v1142_v23  ;;  %3109 = vmatprep.subr.bf16.mxu0 %v3668_v26  ;;  %v1145_v28 = vld [vmem:[%s4279_s27 + $0x18] sm:$0xff] }
 0x8e4   : > { %v2013_v40 = vadd.f32 %v2828_v27, %v2005_v29  ;;  %v1144_v27 = vld [vmem:[%s4279_s27 + $0x10] sm:$0xff] }
 0x8e5   : > { %vm2014_vm13 = vcmp.ge.f32.partialorder %v2012_v63, 0.0  ;;  %v2016_v5 = vmul.f32 0.01, %v2012_v63  ;;  %v3113_v29 = vpack.c.bf16 %v1145_v28, %v1144_v27 }
 0x8e6   : > { %vm2015_vm14 = vcmp.ge.f32.partialorder %v2013_v40, 0.0  ;;  %v2017_v42 = vmul.f32 0.01, %v2013_v40 }
 0x8e7   : > { %v4500_v49 = vsel %vm2014_vm13, %v2012_v63, %v2016_v5  ;;  %v3670_v63 = vmov 0.0  }
 0x8e8   : > { %v2020_v30 = vsel %vm1384_vm7, %v4304_v34, %v4500_v49  ;;  %v4506_v31 = vsel %vm2015_vm14, %v2013_v40, %v2017_v42 }
 0x8e9   : > { %3015 = vmatprep.mubr.msk.f32.mxu0 %vm1153_vm5, %v2020_v30  ;;  %v2021_v32 = vsel %vm1385_vm8, %v4315_v45, %v4506_v31 }
 0x8ea   : > { %3016 = vmatmul.mubr.msk.f32.vlgmr.msra.gmra.mrb[12].mxu0 %vm1153_vm5, %v2021_v32 }
 0x8eb   : > { %3111 = vmatpush3.bf16.msra.mxu0 %v3110_v25  ;;  %3042 = vmatprep.mubr.msk.f32.mxu0 %vm3669_vm3, %v3670_v63 }
 0x8ec   : > { %3112 = vmatprep.subr.bf16.mxu0 %v3668_v26 }
 0x8ef   : > { %3114 = vmatpush3.bf16.msra.mxu0 %v3113_v29 }
 0x9bd   : > { %v3017_v39 = vpop.f32.mrb[12].mxu0 }
 0x9be   : > { %v2106_v35 = vadd.f32 %v3017_v39, %v2829_v33  ;;  %v2100_v37 = vpop.f32.mrb[13].mxu0 }
 0x9bf   : > { %v2101_v34 = vadd.f32 %v2829_v33, %v2100_v37 }
 0x9c0   : > { %v2112_v50 = vrot.slane %v2106_v35, %v4384_v11 }
 0x9c2   : > { %2114 = vrot.lane.b32.xlu0 %v2112_v50, %s3667_s8 }
 0x9c6   : > { %2209 = vperm.xlu0 %3273, %v2206_v52  }
 0x9ca   : > { %2330 = vrot.lane.b32.xlu0 %v2106_v35, %s3666_s30 }
 0x9cb   : > { %3276 = vset.pattern.permute.xlu0 %v3664_v58 }
 0x9ce   : > { %2428 = vperm.xlu0 %3276, %v4221_v8  }
 0xa34   : > { %v2115_v45 = vpop.permute.xlu0 %2114 }
 0xa35   : > { %v2117_v36 = vmul.f32 %v2115_v45, %v2101_v34  ;;  %v2118_v59 = vmul.f32 %v2115_v45, %v2106_v35 }
 0xa37   : > { %2121 = vrot.lane.b32.xlu1 %v2117_v36, %s3665_s17 }
 0xa3b   : > { %2123 = vrot.lane.b32.xlu1 %v2118_v59, %s3665_s17  ;;  %s4576_s17 = scalar_lea.sflag [#allocation4], %s4797_s0 }
 0xa3f   : > { %2212 = vperm.xlu1 %3274, %v2207_v38   ;;  %v1146_v38 = vld [vmem:[%s1064_s14] sm:$0x1] }
 0xa43   : > { %2328 = vrot.lane.b32.xlu1 %v2101_v34, %s3666_s30  ;;  %s3519_s30 = scalar_lea.vmem %s4564_s21, 256 }
 0xa44   : > { %3275 = vset.pattern.permute.xlu1 %v3664_v58  ;;  %p3520_p2 = scmp.ne.s32.totalorder %s4564_s21, %s3519_s30  ;;  %p3527_p7 = scmp.lt.s32.totalorder %s3525_s1, %s3519_s30 }
 0xa45   : > { %v2210_v43 = vpop.permute.xlu0 %2209 }
 0xa46   : > { %vm2214_vm2 = vcmp.eq.s32.totalorder %v2210_v43, 1  ;;  %p3521_p9 = pnand %p3520_p2, %p4798_p11  ;;  %p3528_p5 = por %p3527_p7, %p3526_p3 }
 0xa47   : > { %2423 = vperm.xlu1 %3275, %v4219_v7  }
 0xa48   : > { %p3522_p4 = pneg %p3521_p9 }
 0xa49   : > { %v2331_v40 = vpop.permute.xlu0 %2330 }
 0xa4a   : > { %p3529_p0 = pnand %p3528_p5, %p3522_p4 }
 0xa4d   : > { %v2429_v43 = vpop.permute.xlu0 %2428 }
 0xaa9   : > { %v2122_v61 = vpop.permute.xlu1 %2121 }
 0xaaa   : > { %3026 = vmatprep.mubr.msk.f32.mxu1 %vm1153_vm5, %v2122_v61 }
 0xaad   : > { %v2124_v41 = vpop.permute.xlu1 %2123 }
 0xaae   : > { %3027 = vmatmul.mubr.msk.f32.vlgmr.msra.gmra.mrb[12].mxu1 %vm1153_vm5, %v2124_v41 }
 0xaaf   : > { %3030 = vmatpush3.msk.msra.mxu1 %vm1753_vm11, %v4217_v6 }
 0xabe   : > { %v2213_v8 = vpop.permute.xlu1 %2212 }
 0xabf   : > { %vm2215_vm1 = vcmp.eq.s32.totalorder %v2213_v8, 1 }
 0xac2   : > { %v2329_v42 = vpop.permute.xlu1 %2328 }
 0xb81   : > { %v3028_v15 = vpop.f32.mrb[12].mxu1 }
 0xb82   : > { %v2217_v44 = vsel %vm2215_vm1, -1e+30, %v3028_v15  ;;  %v2195_v46 = vpop.f32.mrb[13].mxu1  ;;  %v2424_v15 = vpop.permute.xlu1 %2423 }
 0xb83   : > { %v2219_v58 = vsel %vm1728_vm12, %v2217_v44, -inf  ;;  %v2216_v47 = vsel %vm2214_vm2, -1e+30, %v2195_v46 }
 0xb84   : > { %v2218_v7 = vsel %vm1728_vm12, %v2216_v47, -inf }
 0xb85   : > { %v2220_v53 = vmax.f32 %v2218_v7, %v2219_v58  ;;  %v2432_v58 = vmul.f32 %v2429_v43, %v4506_v31 }
 0xb87   : > { %v2221_v54 = vrot.slane %v2220_v53, 4 }
 0xb89   : > { %v2222_v55 = vmax.f32 %v2220_v53, %v2221_v54 }
 0xb8b   : > { %v2223_v56 = vrot.slane %v2222_v55, 2 }
 0xb8d   : > { %v2224_v57 = vmax.f32 %v2222_v55, %v2223_v56 }
 0xb8f   : > { %v2225_v60 = vrot.slane %v2224_v57, 1 }
 0xb91   : > { %v2226_v62 = vmax.f32 %v2224_v57, %v2225_v60 }
 0xb93   : > { %v2227_v6 = vsub.f32 %v2216_v47, %v2226_v62  ;;  %v2228_v2 = vsub.f32 %v2217_v44, %v2226_v62  ;;  %v2431_v47 = vmul.f32 %v2424_v15, %v4500_v49 }
 0xb95   : > { %v2229_v3 = vmul.f32 1.442695, %v2227_v6  ;;  %v2231_v9 = vmul.f32 1.442695, %v2228_v2 }
 0xb97   : > { %3305 = vpow2.f32 %v2229_v3 }
 0xb98   : > { %3307 = vpow2.f32 %v2231_v9 }
 0xba1   : > { %v3306_v10 = vpop.eup %3305 }
 0xba2   : > { %v3308_v4 = vpop.eup %3307  ;;  %v2233_v12 = vsel %vm1728_vm12, %v3306_v10, 0.0 }
 0xba3   : > { %v2234_v13 = vsel %vm1728_vm12, %v3308_v4, 0.0 }
 0xba4   : > { %v2235_v14 = vadd.f32 %v2234_v13, %v2233_v12 }
 0xba6   : > { %v2236_v16 = vrot.slane %v2235_v14, 4 }
 0xba8   : > { %v2237_v17 = vadd.f32 %v2236_v16, %v2235_v14 }
 0xbaa   : > { %v2238_v0 = vrot.slane %v2237_v17, 2 }
 0xbac   : > { %v2239_v1 = vadd.f32 %v2238_v0, %v2237_v17 }
 0xbae   : > { %v2240_v18 = vrot.slane %v2239_v1, 1 }
 0xbb0   : > { %v2241_v19 = vadd.f32 %v2240_v18, %v2239_v1 }
 0xbb2   : > { %3309 = vrcp.f32 %v2241_v19 }
 0xbbc   : > { %v3310_v20 = vpop.eup %3309 }
 0xbbd   : > { %v2243_v21 = vmul.f32 %v3310_v20, %v3306_v10  ;;  %v2244_v22 = vmul.f32 %v3310_v20, %v3308_v4 }
 0xbbf   : > { %3031 = vmatprep.mubr.msk.f32.mxu1 %vm1728_vm12, %v2243_v21 }
 0xbc0   : > { %3032 = vmatmul.mubr.msk.f32.vlgmr.msra.gmra.mrb[14].mxu1 %vm1728_vm12, %v2244_v22 }
 0xc93   : > { %v3033_v5 = vpop.f32.mrb[14].mxu1 }
 0xc94   : > { %v2335_v30 = vmul.f32 %v3033_v5, %v2331_v40  ;;  %v2317_v32 = vpop.f32.mrb[15].mxu1 }
 0xc95   : > { %v2334_v33 = vmul.f32 %v2329_v42, %v2317_v32 }
 0xc96   : > { %v2337_v39 = vsel %vm1153_vm5, %v2335_v30, 0.0 }
 0xc97   : > { %v2336_v35 = vsel %vm1153_vm5, %v2334_v33, 0.0 }
 0xc98   : > { %v2338_v37 = vadd.f32 %v2337_v39, %v2336_v35 }
 0xc9a   : > { %v2339_v34 = vrot.slane %v2338_v37, 4 }
 0xc9c   : > { %v2340_v50 = vadd.f32 %v2339_v34, %v2338_v37 }
 0xc9e   : > { %v2341_v52 = vrot.slane %v2340_v50, 2 }
 0xca0   : > { %v2342_v45 = vadd.f32 %v2341_v52, %v2340_v50 }
 0xca2   : > { %v2343_v36 = vrot.slane %v2342_v45, 1 }
 0xca4   : > { %v2344_v59 = vadd.f32 %v2343_v36, %v2342_v45 }
 0xca6   : > { %3043 = vmatmul.mubr.msk.f32.vlgmr.msra.gmra.mrb[14].mxu0 %vm1153_vm5, %v2344_v59 }
 0xd79   : > { %v2414_v61 = vpop.f32.mrb[14].mxu0 }
 0xd7a   : > { %v2415_v41 = vadd.f32 %v2414_v61, %v1146_v38  ;;  %v3044_v8 = vpop.f32.mrb[15].mxu0 }
 0xd7c   : > { %vm2418_vm4 = vcmp.ge.f32.partialorder %v2415_v41, 0.0  ;;  %v2419_v44 = vmul.f32 0.01, %v2415_v41 }
 0xd7e   : > { %v2420_v46 = vsel %vm2418_vm4, %v2415_v41, %v2419_v44 }
 0xd7f   : > { %v2436_v7 = vrot.slane %v2420_v46, %v4384_v11 }
 0xd81   : > { %v2437_v53 = vsel %vm1384_vm7, %v2436_v7, %v2431_v47  ;;  %v2438_v31 = vsel %vm1385_vm8, %v2436_v7, %v2432_v58 }
 0xd82   : > { %2439 = vst.msk [vmem:[%s4282_s13] sm:$0xff] %vm1153_vm5, %v2437_v53  ;;  %2440 = vst.msk [vmem:[%s4282_s13 + $0x8] sm:$0xff] %vm1153_vm5, %v2438_v31 }
 0xd83   : > { %3532 = shalt.err (!%p3529_p0)
}
 0xd84   : > { %s3533_s13 = scalar_lea.hbm %s4562_s16, 256  ;;  %s3537_s19 = scalar_lea.hbm %s4796_s24, 512 }
 0xd85   : > { %p3534_p6 = scmp.ne.s32.totalorder %s4562_s16, %s3533_s13  ;;  %p3538_p8 = scmp.lt.u32.totalorder %s4562_s16, %s4796_s24 }
 0xd86   : > { %p3539_p12 = scmp.lt.u32.totalorder %s3537_s19, %s3533_s13  ;;  %p3541_p2 = scmp.lt.u32.totalorder %s3533_s13, %s4562_s16 }
 0xd87   : > { %p3535_p13 = pnand %p3534_p6, %p4798_p11 }
 0xd88   : > { %p3540_p10 = por %p3539_p12, %p3538_p8 }
 0xd89   : > { %p3536_p1 = pneg %p3535_p13 }
 0xd8a   : > { %p3542_p9 = por %p3541_p2, %p3540_p10 }
 0xd8c   : > { %p3543_p4 = pnand %p3542_p9, %p3536_p1 }
 0xd8e   : > { %3546 = shalt.err (!%p3543_p4)
}
 0xd8f   : > { %s3672_s4 = smov 128   ;;  %s3673_s26 = smov 8  }
 0xd90   : > { %3131 = dma.vmem_to_hbm [thread:$0]  (%p4798_p11), %s4564_s21, 256, %s4562_s16, %s4576_s17, %s3672_s4, %s3672_s4, %s3673_s26  }
 0xd91 PF: > { %s4799_s25 = sld [smem:[#allocation25_spill]]  ;;  %s4800_s5 = sld [smem:[#allocation19_spill]] }
 0xd92   : > { %s4801_s2 = sld [smem:[#allocation31_spill]] }
 0xd97   : > { %p3163_p3 = scmp.ge.s32.totalorder %s4799_s25, 2  ;;  %s2470_s9 = sand.u32 1, %s4800_s5  }
 0xd98   : > { %p4802_p7 = scmp.ne.s32.totalorder %s4801_s2, 0  ;;  %s2471_s8 = scalar_lea.sflag [#allocation4], %s2470_s9 }
 0xd9a   : > { %p3157_p5 = pnand %p3163_p3, %p4802_p7 }
 0xd9c   : > { %3604 = dma.done.wait (!%p3157_p5), %s2471_s8, 256  }
 0xd9d   : > { %3606 = vsyncadd (!%p3157_p5), %s2471_s8, 4294967040  ;;  %s38_s5 = sadd.s32 1, %s4799_s25   ;;  %s4803_s2 = sld [smem:[#allocation17_spill]] }
 0xd9e   : > { %p35_p0 = scmp.ge.s32.totalorder %s38_s5, 6   ;;  %s4804_s25 = sld [smem:[#allocation18_spill]] }
 0xd9f   : > { %s4805_s26 = sld [smem:[#allocation28_spill]]  ;;  %s4806_s27 = sld [smem:[#allocation20_spill]] }
 0xda0   : > { %s4807_s3 = sld [smem:[#allocation21_spill]]  ;;  %s4808_s28 = sld [smem:[#allocation29_spill]] }
 0xda1   : > { %s4809_s29 = sld [smem:[#allocation23_spill]]  ;;  %s4810_s0 = sld [smem:[#allocation24_spill]] }
 0xda2   : > { %s4811_s4 = sld [smem:[#allocation26_spill]]  ;;  %s4812_s30 = sld [smem:[#allocation27_spill]] }
 0xda3   :  { %37 = sbr.rel (!%p35_p0) target bundleno = 33 (0x21), region = 248 }
 0xdaa   :  { %2476 = vsyncpa [#allocation3], 1 }
 0xdab   :  { %2478 = vsyncpa [#allocation3 + $0x1], 1 }
 0xdac   :  { %2479 = vsyncpa [#allocation6], 1 }
 0xdad   :  { %2480 = vsyncpa [#allocation4], 1 }
 0xdae   :  { %2482 = vsyncpa [#allocation4 + $0x1], 1 }

</bundles_post_ra>
